<compile_context>
chip_gen: v5e
topology: v5e:2x2
jax: 0.10.0
libtpu: 0.0.40
codegen_flags: <defaults>
</compile_context>

<pallas_src>
from typing import NamedTuple, Optional

import numpy as np
import jax
import jax.numpy as jnp
from jax.experimental import pallas as pl
from jax.experimental.pallas import tpu as pltpu


# ----------------------------- output spec types -----------------------------
class OutputType:
    DISCRETE = "DISCRETE"
    CONTINUOUS = "CONTINUOUS"


class Normalization:
    ZERO_ONE = "ZERO_ONE"
    MINUSONE_ONE = "MINUSONE_ONE"


class Output(NamedTuple):
    type_: str
    dim: int
    normalization: Optional[str] = None
    is_gen_flag: bool = False


# ------------------------------ small helpers ------------------------------
def _round_up(x, m):
    return ((x + m - 1) // m) * m


def _vmem_spec():
    return pl.BlockSpec(memory_space=pltpu.MemorySpace.VMEM)


def _sigmoid(x):
    # overflow-free sigmoid routed through the EUP tanh unit
    return 0.5 * (jnp.tanh(0.5 * x) + 1.0)


# ------------------------- fused attribute-path kernel -------------------------
def make_attribute_kernel(num_hidden, real_outputs, addi_outputs, out_pad, eps=1e-5):
    """mlp_1 -> post-process -> concat(addi noise) -> mlp_2 -> post-process."""

    def run_mlp(h, refs, p):
        for _ in range(num_hidden):
            w, b, g, be = refs[p][...], refs[p + 1][...], refs[p + 2][...], refs[p + 3][...]
            p += 4
            h = jnp.dot(h, w, preferred_element_type=jnp.float32) + b
            h = jnp.maximum(h, 0.0)                       # ReLU
            # BatchNorm1d, training-mode batch statistics (biased variance)
            mean = jnp.mean(h, axis=0, keepdims=True)
            var = jnp.mean((h - mean) ** 2, axis=0, keepdims=True)
            h = (h - mean) * jax.lax.rsqrt(var + eps) * g + be
        w, b = refs[p][...], refs[p + 1][...]
        p += 2
        return jnp.dot(h, w, preferred_element_type=jnp.float32) + b, p

    def post(x, outputs):
        parts, dparts = [], []
        cur = 0
        for o in outputs:
            sub = x[:, cur:cur + o.dim]
            if o.type_ == OutputType.DISCRETE:
                m = jnp.max(sub, axis=-1, keepdims=True)
                e = jnp.exp(sub - m)
                sm = e / jnp.sum(e, axis=-1, keepdims=True)
                # one_hot(argmax) with torch first-max tie-breaking
                col = jax.lax.broadcasted_iota(jnp.int32, sm.shape, 1)
                mx = jnp.max(sm, axis=-1, keepdims=True)
                first = jnp.min(jnp.where(sm == mx, col, o.dim), axis=-1, keepdims=True)
                oh = (col == first).astype(jnp.float32)
                parts.append(sm)
                dparts.append(oh)
            else:
                a = _sigmoid(sub) if o.normalization == Normalization.ZERO_ONE else jnp.tanh(sub)
                parts.append(a)
                dparts.append(a)
            cur += o.dim
        return jnp.concatenate(parts, axis=1), jnp.concatenate(dparts, axis=1)

    def kernel(*refs):
        attr_noise_ref, addi_noise_ref = refs[0], refs[1]
        attr_out_ref, disc_out_ref = refs[-2], refs[-1]
        p = 2
        real_raw, p = run_mlp(attr_noise_ref[...], refs, p)
        real_attr, real_disc = post(real_raw, real_outputs)
        addi_in = jnp.concatenate([real_disc, addi_noise_ref[...]], axis=1)
        addi_raw, p = run_mlp(addi_in, refs, p)
        addi_attr, addi_disc = post(addi_raw, addi_outputs)
        attr = jnp.concatenate([real_attr, addi_attr], axis=1)
        disc = jnp.concatenate([real_disc, addi_disc], axis=1)
        pad = out_pad - attr.shape[1]
        if pad:
            z = jnp.zeros((attr.shape[0], pad), jnp.float32)
            attr = jnp.concatenate([attr, z], axis=1)
            disc = jnp.concatenate([disc, z], axis=1)
        attr_out_ref[...] = attr      # lane-dense (B, out_pad) stores
        disc_out_ref[...] = disc

    return kernel


def attribute_forward(attr_noise, addi_noise, mlp1_params, mlp2_params,
                      real_outputs, addi_outputs, num_hidden, out_pad):
    B = attr_noise.shape[0]
    args = [attr_noise, addi_noise]
    for hidden, final in (mlp1_params, mlp2_params):
        for quad in hidden:
            args += list(quad)
        args += list(final)
    kernel = make_attribute_kernel(num_hidden, real_outputs, addi_outputs, out_pad)
    out_shapes = (jax.ShapeDtypeStruct((B, out_pad), jnp.float32),
                  jax.ShapeDtypeStruct((B, out_pad), jnp.float32))
    return pl.pallas_call(
        kernel,
        out_shape=out_shapes,
        in_specs=[_vmem_spec() for _ in args],
        out_specs=(_vmem_spec(), _vmem_spec()),
    )(*args)


# ------------------------- LSTM + feature-head chunk kernel -------------------------
def make_lstm_kernel(num_layers, h_pad, tt, bb, np_pad, f_act_pad, nt_pad,
                     fast_act, feature_outputs, sample_len, mm_dtype):
    def lstm_cell(gates, c_prev):
        i_g = _sigmoid(gates[:, 0:h_pad])
        f_g = _sigmoid(gates[:, h_pad:2 * h_pad])
        g_g = jnp.tanh(gates[:, 2 * h_pad:3 * h_pad])
        o_g = _sigmoid(gates[:, 3 * h_pad:4 * h_pad])
        c_new = f_g * c_prev + i_g * g_g
        h_new = o_g * jnp.tanh(c_new)
        return h_new, c_new

    def activate_generic(pre):
        # TODO(synk): slow fallback, only used when a DISCRETE feature has dim != 2.
        pieces, cur = [], 0
        for _j in range(sample_len):
            for o in feature_outputs:
                sub = pre[:, cur:cur + o.dim]
                if o.type_ == OutputType.DISCRETE:
                    m = jnp.max(sub, axis=-1, keepdims=True)
                    e = jnp.exp(sub - m)
                    sub = e / jnp.sum(e, axis=-1, keepdims=True)
                elif o.normalization == Normalization.ZERO_ONE:
                    sub = _sigmoid(sub)
                else:
                    sub = jnp.tanh(sub)
                pieces.append(sub)
                cur += o.dim
        act = jnp.concatenate(pieces, axis=1)
        pad = f_act_pad - act.shape[1]
        if pad:
            act = jnp.concatenate([act, jnp.zeros_like(pre[:, :pad])], axis=1)
        return act

    def kernel(*refs):
        attr_ref, noise_ref = refs[0], refs[1]
        w0a_ref, w0n_ref, w0h_ref, b0_ref = refs[2:6]
        p = 6
        layer_refs = []
        for _ in range(num_layers - 1):
            layer_refs.append((refs[p], refs[p + 1], refs[p + 2]))
            p += 3
        wact_ref, bact_ref, h0_ref, c0_ref, feat_ref = refs[p:p + 5]
        h_carry, c_carry, hbuf = refs[p + 5:p + 8]

        # initialize the carried state at the first time chunk of each batch block
        @pl.when(pl.program_id(1) == 0)
        def _():
            h_carry[...] = h0_ref[...]
            c_carry[...] = c0_ref[...]

        # ---- per-chunk loop-invariant hoists ----
        # attribute + bias contribution to layer-0 gates (time-invariant)
        base0 = (jnp.dot(attr_ref[...].astype(mm_dtype), w0a_ref[...],
                         preferred_element_type=jnp.float32) + b0_ref[...])
        # layer-0 noise contribution for every step of the chunk in ONE matmul
        noise2d = noise_ref[...].reshape(tt * bb, np_pad).astype(mm_dtype)
        noise_gates = jnp.dot(noise2d, w0n_ref[...],
                              preferred_element_type=jnp.float32)

        # keep h/c as SSA values across the unrolled chunk (no per-step VMEM RT)
        hs = [h_carry[l] for l in range(num_layers)]
        cs = [c_carry[l] for l in range(num_layers)]

        for t in range(tt):
            g0 = (jnp.dot(hs[0].astype(mm_dtype), w0h_ref[...],
                          preferred_element_type=jnp.float32)
                  + noise_gates[t * bb:(t + 1) * bb, :] + base0)
            hs[0], cs[0] = lstm_cell(g0, cs[0])
            prev_h = hs[0]
            for l in range(1, num_layers):
                wi_ref, wh_ref, bl_ref = layer_refs[l - 1]
                g = (jnp.dot(prev_h.astype(mm_dtype), wi_ref[...],
                             preferred_element_type=jnp.float32)
                     + jnp.dot(hs[l].astype(mm_dtype), wh_ref[...],
                               preferred_element_type=jnp.float32)
                     + bl_ref[...])
                hs[l], cs[l] = lstm_cell(g, cs[l])
                prev_h = hs[l]
            # stash top-layer h for the hoisted output head
            hbuf[t * bb:(t + 1) * bb, :] = prev_h

        # write carried state back once per chunk
        for l in range(num_layers):
            h_carry[l] = hs[l]
            c_carry[l] = cs[l]

        # ---- hoisted output head: one big matmul + activation per chunk ----
        pre = (jnp.dot(hbuf[...].astype(mm_dtype), wact_ref[...],
                       preferred_element_type=jnp.float32) + bact_ref[...])
        if fast_act:
            parts = []
            if nt_pad > 0:
                parts.append(jnp.tanh(pre[:, :nt_pad]))
            if f_act_pad > nt_pad:
                parts.append(_sigmoid(pre[:, nt_pad:]))
            act = parts[0] if len(parts) == 1 else jnp.concatenate(parts, axis=1)
        else:
            act = activate_generic(pre)
        feat_ref[...] = act.reshape(tt, bb, f_act_pad)   # lane-dense bulk store

    return kernel


def lstm_unroll(attr_disc_pad, noise_pad, params, h0_pad, c0_pad,
                feature_outputs, sample_len, fast_act, nt_pad,
                block_batch, block_time, mm_dtype):
    (w0_attr, w0_noise, w0_hh, b0, layer_ws, w_act, b_act) = params
    T_pad, B_pad, NP = noise_pad.shape
    L, _, H_pad = h0_pad.shape
    F_act_pad = w_act.shape[1]
    A_pad = attr_disc_pad.shape[1]
    BB, TT = block_batch, block_time
    assert B_pad % BB == 0 and T_pad % TT == 0

    args = [attr_disc_pad, noise_pad, w0_attr, w0_noise, w0_hh, b0]
    for (wi, wh, b) in layer_ws:
        args += [wi, wh, b]
    args += [w_act, b_act, h0_pad, c0_pad]

    def full_spec(x):
        shape = x.shape
        return pl.BlockSpec(shape, lambda b, t, _s=shape: (0,) * len(_s))

    in_specs = [
        pl.BlockSpec((BB, A_pad), lambda b, t: (b, 0)),
        pl.BlockSpec((TT, BB, NP), lambda b, t: (t, b, 0)),
        full_spec(w0_attr), full_spec(w0_noise), full_spec(w0_hh), full_spec(b0),
    ]
    for (wi, wh, b) in layer_ws:
        in_specs += [full_spec(wi), full_spec(wh), full_spec(b)]
    in_specs += [full_spec(w_act), full_spec(b_act),
                 pl.BlockSpec((L, BB, H_pad), lambda b, t: (0, b, 0)),
                 pl.BlockSpec((L, BB, H_pad), lambda b, t: (0, b, 0))]

    kernel = make_lstm_kernel(L, H_pad, TT, BB, NP, F_act_pad, nt_pad,
                              fast_act, feature_outputs, sample_len, mm_dtype)

    # explicit VMEM budget (defaults are 16 MiB on v5e / 32 MiB on v6e & v7x)
    def nbytes(a):
        return int(np.prod(a.shape)) * a.dtype.itemsize
    weight_bytes = sum(nbytes(a) for a in args[2:-2])
    block_bytes = 4 * (BB * A_pad + TT * BB * NP + 2 * L * BB * H_pad
                       + TT * BB * F_act_pad)
    scratch_bytes = 4 * (2 * L * BB * H_pad + TT * BB * H_pad)
    interm_bytes = 4 * (TT * BB * 4 * H_pad + 2 * TT * BB * F_act_pad
                        + 8 * BB * H_pad)
    est = 2 * (weight_bytes + block_bytes) + scratch_bytes + 2 * interm_bytes
    vmem_limit = int(min(max(2 * est, 32 * 2 ** 20), 64 * 2 ** 20))

    return pl.pallas_call(
        kernel,
        out_shape=jax.ShapeDtypeStruct((T_pad, B_pad, F_act_pad), jnp.float32),
        grid=(B_pad // BB, T_pad // TT),
        in_specs=in_specs,
        out_specs=pl.BlockSpec((TT, BB, F_act_pad), lambda b, t: (t, b, 0)),
        scratch_shapes=[pltpu.VMEM((L, BB, H_pad), jnp.float32),
                        pltpu.VMEM((L, BB, H_pad), jnp.float32),
                        pltpu.VMEM((TT * BB, H_pad), jnp.float32)],
        compiler_params=pltpu.CompilerParams(
            dimension_semantics=("parallel", "arbitrary"),
            vmem_limit_bytes=vmem_limit),
    )(*args)


# ------------------------------ generator wrapper ------------------------------
class DoppelGANgerGeneratorPallas:
    def __init__(self, key, feed_back, noise, feature_outputs, attribute_outputs,
                 real_attribute_mask, sample_len,
                 attribute_num_units=100, attribute_num_layers=3,
                 feature_num_units=100, feature_num_layers=2,
                 attribute_input_noise_dim=5, addi_attribute_input_noise_dim=5,
                 feature_input_noise_dim=5):
        assert noise and not feed_back, \
            "only the default noise=True / feed_back=False path is implemented"
        self.sample_len = sample_len
        self.feature_outputs = feature_outputs
        self.attribute_outputs = attribute_outputs
        self.feature_out_dim = int(sum(o.dim for o in feature_outputs)) * sample_len
        self.attribute_out_dim = int(sum(o.dim for o in attribute_outputs))
        self.feature_num_units = feature_num_units
        self.feature_num_layers = feature_num_layers
        self.feature_input_noise_dim = feature_input_noise_dim
        self.attribute_num_hidden = attribute_num_layers - 1

        self.real_attribute_outputs, self.addi_attribute_outputs = [], []
        self.real_attribute_out_dim = self.addi_attribute_out_dim = 0
        for m, o in zip(real_attribute_mask, attribute_outputs):
            if m:
                self.real_attribute_outputs.append(o)
                self.real_attribute_out_dim += o.dim
            else:
                self.addi_attribute_outputs.append(o)
                self.addi_attribute_out_dim += o.dim

        self.gen_flag_id = None
        for i, o in enumerate(feature_outputs):
            if o.is_gen_flag:
                self.gen_flag_id = i
                break
        assert self.gen_flag_id is not None and feature_outputs[self.gen_flag_id].dim == 2

        # deterministic synthetic parameters
        keys = iter(jax.random.split(key, 64))

        def w(shape, scale=0.1):
            return scale * jax.random.normal(next(keys), shape, jnp.float32)

        U = attribute_num_units
        U_pad = _round_up(U, 128)

        def build_mlp(in_dim, out_dim):
            # hidden widths zero-padded to 128 lanes (math identical to width U)
            dims = [in_dim] + [U] * (attribute_num_layers - 1)
            dims_p = [in_dim] + [U_pad] * (attribute_num_layers - 1)
            hidden = []
            for i in range(len(dims) - 1):
                W = jnp.pad(w((dims[i], dims[i + 1])),
                            ((0, dims_p[i] - dims[i]), (0, dims_p[i + 1] - dims[i + 1])))
                b = jnp.pad(w((1, dims[i + 1])), ((0, 0), (0, dims_p[i + 1] - dims[i + 1])))
                g = jnp.ones((1, dims_p[i + 1]), jnp.float32)
                be = jnp.zeros((1, dims_p[i + 1]), jnp.float32)
                hidden.append((W, b, g, be))
            Wf = jnp.pad(w((dims[-1], out_dim)), ((0, dims_p[-1] - dims[-1]), (0, 0)))
            bf = w((1, out_dim))
            return hidden, (Wf, bf)

        self.mlp1_hidden, self.mlp1_final = build_mlp(
            attribute_input_noise_dim, self.real_attribute_out_dim)
        self.mlp2_hidden, self.mlp2_final = build_mlp(
            self.real_attribute_out_dim + addi_attribute_input_noise_dim,
            self.addi_attribute_out_dim)

        H = feature_num_units
        in_size = self.attribute_out_dim + feature_input_noise_dim
        self.lstm_params = []
        for l in range(feature_num_layers):
            din = in_size if l == 0 else H
            # gate order (i, f, g, o); bias = b_ih + b_hh folded together
            self.lstm_params.append((w((din, 4 * H)), w((H, 4 * H)), w((1, 4 * H))))
        self.mlp_rnn_w = w((H, self.feature_out_dim))
        self.mlp_rnn_b = w((1, self.feature_out_dim))

        self._prepare_lstm(feature_input_noise_dim)

    # ---- one-time padding / fusing / grouping of LSTM + output-head parameters ----
    def _prepare_lstm(self, noise_dim):
        H = self.feature_num_units
        L = self.feature_num_layers
        A = self.attribute_out_dim
        F = self.feature_out_dim
        H_pad = _round_up(H, 128)
        NP = _round_up(noise_dim, 128)
        A_pad = _round_up(A, 128)
        # bf16 matmul operands (f32 accumulation) once the hidden size is big
        # enough to matter; elementwise LSTM-cell math stays f32.
        mm_dtype = jnp.bfloat16 if H >= 256 else jnp.float32

        def pad_gate_cols(wm):
            r = wm.shape[0]
            w4 = wm.reshape(r, 4, H)
            return jnp.pad(w4, ((0, 0), (0, 0), (0, H_pad - H))).reshape(r, 4 * H_pad)

        def pad_rows(wm, rows):
            return jnp.pad(wm, ((0, rows - wm.shape[0]), (0, 0)))

        wih0, whh0, bias0 = self.lstm_params[0]
        self.w0_attr = pad_rows(pad_gate_cols(wih0[:A]), A_pad).astype(mm_dtype)
        self.w0_noise = pad_rows(pad_gate_cols(wih0[A:]), NP).astype(mm_dtype)
        self.w0_hh = pad_rows(pad_gate_cols(whh0), H_pad).astype(mm_dtype)
        self.b0_pad = pad_gate_cols(bias0)                      # bias stays f32

        self.layer_ws = []
        for l in range(1, L):
            wih, whh, b = self.lstm_params[l]
            self.layer_ws.append((
                pad_rows(pad_gate_cols(wih), H_pad).astype(mm_dtype),
                pad_rows(pad_gate_cols(whh), H_pad).astype(mm_dtype),
                pad_gate_cols(b)))

        # ---- output head ----
        # dim-2 DISCRETE softmax folded into pairwise-difference columns so it
        # becomes a sigmoid; columns then grouped by activation (tanh group
        # first, sigmoid group second), each group padded to 128 lanes.
        per_step = [o for _ in range(self.sample_len) for o in self.feature_outputs]
        fast = all(o.dim == 2 for o in per_step if o.type_ == OutputType.DISCRETE)
        if fast:
            M = np.eye(F, dtype=np.float32)
            tanh_cols, sig_cols = [], []
            cur = 0
            for o in per_step:
                if o.type_ == OutputType.DISCRETE:
                    M[cur + 1, cur] = -1.0     # new col c   = col c   - col c+1
                    M[cur, cur + 1] = -1.0     # new col c+1 = col c+1 - col c
                    sig_cols += [cur, cur + 1]
                elif o.normalization == Normalization.ZERO_ONE:
                    sig_cols += list(range(cur, cur + o.dim))
                else:
                    tanh_cols += list(range(cur, cur + o.dim))
                cur += o.dim
            NT, NS = len(tanh_cols), len(sig_cols)
            NT_PAD = _round_up(NT, 128) if NT else 0
            NS_PAD = _round_up(NS, 128) if NS else 0
            F_act_pad = NT_PAD + NS_PAD
            w_t = jnp.dot(self.mlp_rnn_w, jnp.asarray(M))
            b_t = jnp.dot(self.mlp_rnn_b, jnp.asarray(M))
            w_act = jnp.zeros((H_pad, F_act_pad), jnp.float32)
            b_act = jnp.zeros((1, F_act_pad), jnp.float32)
            inv = np.zeros((F,), np.int32)
            if NT:
                ti = jnp.asarray(tanh_cols, dtype=jnp.int32)
                w_act = w_act.at[:H, :NT].set(w_t[:, ti])
                b_act = b_act.at[:, :NT].set(b_t[:, ti])
                inv[np.asarray(tanh_cols)] = np.arange(NT, dtype=np.int32)
            if NS:
                si = jnp.asarray(sig_cols, dtype=jnp.int32)
                w_act = w_act.at[:H, NT_PAD:NT_PAD + NS].set(w_t[:, si])
                b_act = b_act.at[:, NT_PAD:NT_PAD + NS].set(b_t[:, si])
                inv[np.asarray(sig_cols)] = NT_PAD + np.arange(NS, dtype=np.int32)
            self.inv_cols = jnp.asarray(inv)
            self.nt_pad = NT_PAD
        else:
            # TODO(synk): generic fallback keeps the original column order
            F_act_pad = _round_up(F, 128)
            w_act = jnp.pad(self.mlp_rnn_w, ((0, H_pad - H), (0, F_act_pad - F)))
            b_act = jnp.pad(self.mlp_rnn_b, ((0, 0), (0, F_act_pad - F)))
            self.inv_cols = None
            self.nt_pad = 0

        self.w_act = w_act.astype(mm_dtype)
        self.b_act = b_act
        self.fast_act = fast
        self.mm_dtype = mm_dtype
        self.H_pad, self.NP, self.A_pad, self.F_act_pad = H_pad, NP, A_pad, F_act_pad

    def forward(self, attribute_input_noise, addi_attribute_input_noise,
                feature_input_noise, feature_input_data, state_key):
        B = feature_input_data.shape[0]
        T = feature_input_noise.shape[1]
        S = self.sample_len
        F = self.feature_out_dim
        per_sample = F // S
        noise_dim = feature_input_noise.shape[2]
        assert noise_dim == self.feature_input_noise_dim

        # ----- attribute generation (single fused Pallas kernel, lane-dense outs) -----
        attr_full, disc_full = attribute_forward(
            attribute_input_noise, addi_attribute_input_noise,
            (self.mlp1_hidden, self.mlp1_final),
            (self.mlp2_hidden, self.mlp2_final),
            self.real_attribute_outputs, self.addi_attribute_outputs,
            self.attribute_num_hidden, self.A_pad)
        all_attribute = attr_full[:, :self.attribute_out_dim]

        # ----- sequence generation (Pallas LSTM-chunk kernel) -----
        BB = min(128, _round_up(B, 8))
        B_pad = _round_up(B, BB)
        if T <= 16:
            TT = T
        else:
            TT = min(range(8, 17), key=lambda c: (_round_up(T, c), -c))
        T_pad = _round_up(T, TT)
        H, L = self.feature_num_units, self.feature_num_layers

        # RNNInitialStateType.RANDOM
        kh, kc = jax.random.split(state_key)
        h0 = jax.random.normal(kh, (L, B, H), jnp.float32)
        c0 = jax.random.normal(kc, (L, B, H), jnp.float32)

        attr_disc_pad = jnp.pad(disc_full, ((0, B_pad - B), (0, 0)))
        noise_tbf = jnp.transpose(feature_input_noise, (1, 0, 2))        # time-major
        noise_pad = jnp.pad(noise_tbf, ((0, T_pad - T), (0, B_pad - B),
                                        (0, self.NP - noise_dim)))
        h0_pad = jnp.pad(h0, ((0, 0), (0, B_pad - B), (0, self.H_pad - H)))
        c0_pad = jnp.pad(c0, ((0, 0), (0, B_pad - B), (0, self.H_pad - H)))

        feat = lstm_unroll(
            attr_disc_pad, noise_pad,
            (self.w0_attr, self.w0_noise, self.w0_hh, self.b0_pad,
             self.layer_ws, self.w_act, self.b_act),
            h0_pad, c0_pad, self.feature_outputs, S,
            self.fast_act, self.nt_pad, BB, TT, self.mm_dtype)

        feat_g = jnp.transpose(feat, (1, 0, 2))[:B, :T, :]               # (B, T, F_act_pad)
        if self.fast_act:
            feat_raw = feat_g[:, :, self.inv_cols]                       # undo column grouping
        else:
            feat_raw = feat_g[:, :, :F]

        # ----- gen_flag / argmax / early-`break` bookkeeping (plain JAX) -----
        gen_off = int(sum(o.dim for o in self.feature_outputs[:self.gen_flag_id]))
        cols0 = np.array([j * per_sample + gen_off for j in range(S)], np.int32)
        p0 = feat_raw[:, :, cols0]
        p1 = feat_raw[:, :, cols0 + 1]
        am = (p1 > p0)                                       # torch argmax of dim-2 softmax
        cur = jnp.logical_not(am).astype(jnp.float32)        # cur_gen_flag = (argmax == 0)
        incl = jnp.cumprod(cur.reshape(B, T * S), axis=1)
        gf_appended = jnp.concatenate(
            [jnp.ones((B, 1), jnp.float32), incl[:, :-1]], axis=1)       # (B, T*S)

        # replicate the python-level early `break` (only cur_argmax needs masking)
        postgf = incl.reshape(B, T, S)[:, :, -1]                         # (B, T)
        step_dead = jnp.max(postgf, axis=0) == 0.0
        time_used = jnp.where(jnp.any(step_dead), jnp.argmax(step_dead) + 1, T)
        step_mask = (jnp.arange(T) < time_used).astype(jnp.float32)

        cur_argmax = (am.astype(jnp.float32) * step_mask[None, :, None]
                      ).reshape(B, T * S).astype(jnp.int32)
        gen_flag = gf_appended.reshape(B, T * S, 1)
        length = jnp.sum(gen_flag, axis=(1, 2))
        gen_flag_t = (jnp.sum(gf_appended.reshape(B, T, S), axis=2) > 0.5
                      ).astype(jnp.float32)                              # (B, T)
        feature = (feat_raw * gen_flag_t[:, :, None]).reshape(B, T * S, per_sample)
        return feature, all_attribute, gen_flag, length, cur_argmax


# ------------------------------------- main -------------------------------------
if __name__ == "__main__":
    feature_outputs = [
        Output(OutputType.CONTINUOUS, 1, Normalization.MINUSONE_ONE, False),
        Output(OutputType.DISCRETE, 2, None, True),          # gen-flag output (dim must be 2)
    ]
    attribute_outputs = [
        Output(OutputType.DISCRETE, 3, None, False),
        Output(OutputType.CONTINUOUS, 2, Normalization.ZERO_ONE, False),
        Output(OutputType.CONTINUOUS, 2, Normalization.ZERO_ONE, False),  # additional (max/min)
    ]
    real_attribute_mask = [True, True, False]

    key = jax.random.PRNGKey(0)
    pkey, xkey = jax.random.split(key)
    gen = DoppelGANgerGeneratorPallas(
        pkey, feed_back=False, noise=True,
        feature_outputs=feature_outputs, attribute_outputs=attribute_outputs,
        real_attribute_mask=real_attribute_mask, sample_len=2,
        attribute_num_units=32, attribute_num_layers=3,
        feature_num_units=32, feature_num_layers=2,
        attribute_input_noise_dim=5, addi_attribute_input_noise_dim=5,
        feature_input_noise_dim=5)

    B, T = 4, 6
    k1, k2, k3, k4 = jax.random.split(xkey, 4)
    attribute_input_noise = jax.random.normal(k1, (B, 5), jnp.float32)
    addi_attribute_input_noise = jax.random.normal(k2, (B, 5), jnp.float32)
    feature_input_noise = jax.random.normal(k3, (B, T, 5), jnp.float32)
    # only the batch dimension of feature_input_data is used when feed_back=False
    feature_input_data = jnp.zeros((B, T * 2, 3), jnp.float32)

    outs = gen.forward(attribute_input_noise, addi_attribute_input_noise,
                       feature_input_noise, feature_input_data, state_key=k4)
    for o in outs:
        jax.block_until_ready(o)

    feature, all_attribute, gen_flag, length, cur_argmax = outs
    assert feature.shape == (B, T * 2, 3)
    assert all_attribute.shape == (B, 7)
    assert gen_flag.shape == (B, T * 2, 1)
    assert length.shape == (B,)
    assert cur_argmax.shape == (B, T * 2)
    print("KERNEL_OK")
</pallas_src>

<mosaic_0001>
module attributes {stable_mosaic.version = 11 : i64} {
  func.func @kernel(%arg0: memref<4x5xf32, #tpu.memory_space<vmem>>, %arg1: memref<4x5xf32, #tpu.memory_space<vmem>>, %arg2: memref<5x128xf32, #tpu.memory_space<vmem>>, %arg3: memref<1x128xf32, #tpu.memory_space<vmem>>, %arg4: memref<1x128xf32, #tpu.memory_space<vmem>>, %arg5: memref<1x128xf32, #tpu.memory_space<vmem>>, %arg6: memref<128x128xf32, #tpu.memory_space<vmem>>, %arg7: memref<1x128xf32, #tpu.memory_space<vmem>>, %arg8: memref<1x128xf32, #tpu.memory_space<vmem>>, %arg9: memref<1x128xf32, #tpu.memory_space<vmem>>, %arg10: memref<128x5xf32, #tpu.memory_space<vmem>>, %arg11: memref<1x5xf32, #tpu.memory_space<vmem>>, %arg12: memref<10x128xf32, #tpu.memory_space<vmem>>, %arg13: memref<1x128xf32, #tpu.memory_space<vmem>>, %arg14: memref<1x128xf32, #tpu.memory_space<vmem>>, %arg15: memref<1x128xf32, #tpu.memory_space<vmem>>, %arg16: memref<128x128xf32, #tpu.memory_space<vmem>>, %arg17: memref<1x128xf32, #tpu.memory_space<vmem>>, %arg18: memref<1x128xf32, #tpu.memory_space<vmem>>, %arg19: memref<1x128xf32, #tpu.memory_space<vmem>>, %arg20: memref<128x2xf32, #tpu.memory_space<vmem>>, %arg21: memref<1x2xf32, #tpu.memory_space<vmem>>, %arg22: memref<4x128xf32, #tpu.memory_space<vmem>>, %arg23: memref<4x128xf32, #tpu.memory_space<vmem>>) attributes {dimension_semantics = [], scalar_prefetch = 0 : i64, scratch_operands = 0 : i64, tpu.core_type = #tpu.core_type<tc>} {
    %c0 = arith.constant 0 : index
    %c0_0 = arith.constant 0 : index
    %0 = vector.load %arg0[%c0, %c0_0] : memref<4x5xf32, #tpu.memory_space<vmem>>, vector<4x5xf32>
    %c0_1 = arith.constant 0 : index
    %c0_2 = arith.constant 0 : index
    %1 = vector.load %arg2[%c0_1, %c0_2] : memref<5x128xf32, #tpu.memory_space<vmem>>, vector<5x128xf32>
    %c0_3 = arith.constant 0 : index
    %c0_4 = arith.constant 0 : index
    %2 = vector.load %arg3[%c0_3, %c0_4] : memref<1x128xf32, #tpu.memory_space<vmem>>, vector<1x128xf32>
    %c0_5 = arith.constant 0 : index
    %c0_6 = arith.constant 0 : index
    %3 = vector.load %arg4[%c0_5, %c0_6] : memref<1x128xf32, #tpu.memory_space<vmem>>, vector<1x128xf32>
    %c0_7 = arith.constant 0 : index
    %c0_8 = arith.constant 0 : index
    %4 = vector.load %arg5[%c0_7, %c0_8] : memref<1x128xf32, #tpu.memory_space<vmem>>, vector<1x128xf32>
    %cst = arith.constant dense<0.000000e+00> : vector<4x128xf32>
    %5 = tpu.matmul %0, %1, %cst {dimension_numbers = #tpu.dot_dimension_numbers<[1], [0], [0], [1], [0, 0, 1, 1], [], []>} : vector<4x5xf32>, vector<5x128xf32>, vector<4x128xf32> -> vector<4x128xf32>
    %6 = vector.broadcast %2 : vector<1x128xf32> to vector<4x128xf32>
    %7 = arith.addf %5, %6 : vector<4x128xf32>
    %cst_9 = arith.constant 0.000000e+00 : f32
    %8 = vector.broadcast %cst_9 : f32 to vector<4x128xf32>
    %9 = arith.maximumf %7, %8 : vector<4x128xf32>
    %cst_10 = arith.constant dense<0.000000e+00> : vector<128xf32>
    %10 = vector.multi_reduction <add>, %9, %cst_10 [0] : vector<4x128xf32> to vector<128xf32>
    %11 = vector.shape_cast %10 : vector<128xf32> to vector<1x128xf32>
    %cst_11 = arith.constant 4.000000e+00 : f32
    %12 = vector.broadcast %cst_11 : f32 to vector<1x128xf32>
    %13 = arith.divf %11, %12 : vector<1x128xf32>
    %14 = vector.broadcast %13 : vector<1x128xf32> to vector<4x128xf32>
    %15 = arith.subf %9, %14 : vector<4x128xf32>
    %16 = arith.mulf %15, %15 : vector<4x128xf32>
    %cst_12 = arith.constant dense<0.000000e+00> : vector<128xf32>
    %17 = vector.multi_reduction <add>, %16, %cst_12 [0] : vector<4x128xf32> to vector<128xf32>
    %18 = vector.shape_cast %17 : vector<128xf32> to vector<1x128xf32>
    %cst_13 = arith.constant 4.000000e+00 : f32
    %19 = vector.broadcast %cst_13 : f32 to vector<1x128xf32>
    %20 = arith.divf %18, %19 : vector<1x128xf32>
    %21 = vector.broadcast %13 : vector<1x128xf32> to vector<4x128xf32>
    %22 = arith.subf %9, %21 : vector<4x128xf32>
    %cst_14 = arith.constant 9.99999974E-6 : f32
    %23 = vector.broadcast %cst_14 : f32 to vector<1x128xf32>
    %24 = arith.addf %20, %23 : vector<1x128xf32>
    %25 = math.rsqrt %24 : vector<1x128xf32>
    %26 = vector.broadcast %25 : vector<1x128xf32> to vector<4x128xf32>
    %27 = arith.mulf %22, %26 : vector<4x128xf32>
    %28 = vector.broadcast %3 : vector<1x128xf32> to vector<4x128xf32>
    %29 = arith.mulf %27, %28 : vector<4x128xf32>
    %30 = vector.broadcast %4 : vector<1x128xf32> to vector<4x128xf32>
    %31 = arith.addf %29, %30 : vector<4x128xf32>
    %c0_15 = arith.constant 0 : index
    %c0_16 = arith.constant 0 : index
    %32 = vector.load %arg6[%c0_15, %c0_16] : memref<128x128xf32, #tpu.memory_space<vmem>>, vector<128x128xf32>
    %c0_17 = arith.constant 0 : index
    %c0_18 = arith.constant 0 : index
    %33 = vector.load %arg7[%c0_17, %c0_18] : memref<1x128xf32, #tpu.memory_space<vmem>>, vector<1x128xf32>
    %c0_19 = arith.constant 0 : index
    %c0_20 = arith.constant 0 : index
    %34 = vector.load %arg8[%c0_19, %c0_20] : memref<1x128xf32, #tpu.memory_space<vmem>>, vector<1x128xf32>
    %c0_21 = arith.constant 0 : index
    %c0_22 = arith.constant 0 : index
    %35 = vector.load %arg9[%c0_21, %c0_22] : memref<1x128xf32, #tpu.memory_space<vmem>>, vector<1x128xf32>
    %cst_23 = arith.constant dense<0.000000e+00> : vector<4x128xf32>
    %36 = tpu.matmul %31, %32, %cst_23 {dimension_numbers = #tpu.dot_dimension_numbers<[1], [0], [0], [1], [0, 0, 1, 1], [], []>} : vector<4x128xf32>, vector<128x128xf32>, vector<4x128xf32> -> vector<4x128xf32>
    %37 = vector.broadcast %33 : vector<1x128xf32> to vector<4x128xf32>
    %38 = arith.addf %36, %37 : vector<4x128xf32>
    %cst_24 = arith.constant 0.000000e+00 : f32
    %39 = vector.broadcast %cst_24 : f32 to vector<4x128xf32>
    %40 = arith.maximumf %38, %39 : vector<4x128xf32>
    %cst_25 = arith.constant dense<0.000000e+00> : vector<128xf32>
    %41 = vector.multi_reduction <add>, %40, %cst_25 [0] : vector<4x128xf32> to vector<128xf32>
    %42 = vector.shape_cast %41 : vector<128xf32> to vector<1x128xf32>
    %cst_26 = arith.constant 4.000000e+00 : f32
    %43 = vector.broadcast %cst_26 : f32 to vector<1x128xf32>
    %44 = arith.divf %42, %43 : vector<1x128xf32>
    %45 = vector.broadcast %44 : vector<1x128xf32> to vector<4x128xf32>
    %46 = arith.subf %40, %45 : vector<4x128xf32>
    %47 = arith.mulf %46, %46 : vector<4x128xf32>
    %cst_27 = arith.constant dense<0.000000e+00> : vector<128xf32>
    %48 = vector.multi_reduction <add>, %47, %cst_27 [0] : vector<4x128xf32> to vector<128xf32>
    %49 = vector.shape_cast %48 : vector<128xf32> to vector<1x128xf32>
    %cst_28 = arith.constant 4.000000e+00 : f32
    %50 = vector.broadcast %cst_28 : f32 to vector<1x128xf32>
    %51 = arith.divf %49, %50 : vector<1x128xf32>
    %52 = vector.broadcast %44 : vector<1x128xf32> to vector<4x128xf32>
    %53 = arith.subf %40, %52 : vector<4x128xf32>
    %cst_29 = arith.constant 9.99999974E-6 : f32
    %54 = vector.broadcast %cst_29 : f32 to vector<1x128xf32>
    %55 = arith.addf %51, %54 : vector<1x128xf32>
    %56 = math.rsqrt %55 : vector<1x128xf32>
    %57 = vector.broadcast %56 : vector<1x128xf32> to vector<4x128xf32>
    %58 = arith.mulf %53, %57 : vector<4x128xf32>
    %59 = vector.broadcast %34 : vector<1x128xf32> to vector<4x128xf32>
    %60 = arith.mulf %58, %59 : vector<4x128xf32>
    %61 = vector.broadcast %35 : vector<1x128xf32> to vector<4x128xf32>
    %62 = arith.addf %60, %61 : vector<4x128xf32>
    %c0_30 = arith.constant 0 : index
    %c0_31 = arith.constant 0 : index
    %63 = vector.load %arg10[%c0_30, %c0_31] : memref<128x5xf32, #tpu.memory_space<vmem>>, vector<128x5xf32>
    %c0_32 = arith.constant 0 : index
    %c0_33 = arith.constant 0 : index
    %64 = vector.load %arg11[%c0_32, %c0_33] : memref<1x5xf32, #tpu.memory_space<vmem>>, vector<1x5xf32>
    %cst_34 = arith.constant dense<0.000000e+00> : vector<4x5xf32>
    %65 = tpu.matmul %62, %63, %cst_34 {dimension_numbers = #tpu.dot_dimension_numbers<[1], [0], [0], [1], [0, 0, 1, 1], [], []>} : vector<4x128xf32>, vector<128x5xf32>, vector<4x5xf32> -> vector<4x5xf32>
    %66 = vector.broadcast %64 : vector<1x5xf32> to vector<4x5xf32>
    %67 = arith.addf %65, %66 : vector<4x5xf32>
    %68 = vector.extract_strided_slice %67 {offsets = [0, 0], sizes = [4, 3], strides = [1, 1]} : vector<4x5xf32> to vector<4x3xf32>
    %cst_35 = arith.constant dense<0xFF800000> : vector<4xf32>
    %69 = vector.multi_reduction <maximumf>, %68, %cst_35 [1] : vector<4x3xf32> to vector<4xf32>
    %70 = vector.shape_cast %69 : vector<4xf32> to vector<4x1xf32>
    %71 = vector.broadcast %70 : vector<4x1xf32> to vector<4x3xf32>
    %72 = arith.subf %68, %71 : vector<4x3xf32>
    %73 = math.exp %72 : vector<4x3xf32>
    %cst_36 = arith.constant dense<0.000000e+00> : vector<4xf32>
    %74 = vector.multi_reduction <add>, %73, %cst_36 [1] : vector<4x3xf32> to vector<4xf32>
    %75 = vector.shape_cast %74 : vector<4xf32> to vector<4x1xf32>
    %76 = vector.broadcast %75 : vector<4x1xf32> to vector<4x3xf32>
    %77 = arith.divf %73, %76 : vector<4x3xf32>
    %78 = tpu.iota {dimensions = array<i32: 1>} : vector<4x3xi32>
    %cst_37 = arith.constant dense<0xFF800000> : vector<4xf32>
    %79 = vector.multi_reduction <maximumf>, %77, %cst_37 [1] : vector<4x3xf32> to vector<4xf32>
    %80 = vector.shape_cast %79 : vector<4xf32> to vector<4x1xf32>
    %81 = vector.broadcast %80 : vector<4x1xf32> to vector<4x3xf32>
    %82 = arith.cmpf oeq, %77, %81 : vector<4x3xf32>
    %c3_i32 = arith.constant 3 : i32
    %83 = vector.broadcast %c3_i32 : i32 to vector<4x3xi32>
    %84 = arith.select %82, %78, %83 : vector<4x3xi1>, vector<4x3xi32>
    %cst_38 = arith.constant dense<2147483647> : vector<4xi32>
    %85 = vector.multi_reduction <minsi>, %84, %cst_38 [1] : vector<4x3xi32> to vector<4xi32>
    %86 = vector.shape_cast %85 : vector<4xi32> to vector<4x1xi32>
    %87 = vector.broadcast %86 : vector<4x1xi32> to vector<4x3xi32>
    %88 = arith.cmpi eq, %78, %87 : vector<4x3xi32>
    %89 = arith.extui %88 : vector<4x3xi1> to vector<4x3xi32>
    %90 = arith.sitofp %89 : vector<4x3xi32> to vector<4x3xf32>
    %91 = vector.extract_strided_slice %67 {offsets = [0, 3], sizes = [4, 2], strides = [1, 1]} : vector<4x5xf32> to vector<4x2xf32>
    %cst_39 = arith.constant 5.000000e-01 : f32
    %92 = vector.broadcast %cst_39 : f32 to vector<4x2xf32>
    %93 = arith.mulf %92, %91 : vector<4x2xf32>
    %94 = math.tanh %93 : vector<4x2xf32>
    %cst_40 = arith.constant 1.000000e+00 : f32
    %95 = vector.broadcast %cst_40 : f32 to vector<4x2xf32>
    %96 = arith.addf %94, %95 : vector<4x2xf32>
    %cst_41 = arith.constant 5.000000e-01 : f32
    %97 = vector.broadcast %cst_41 : f32 to vector<4x2xf32>
    %98 = arith.mulf %97, %96 : vector<4x2xf32>
    %99 = tpu.concatenate %77, %98 in 1 : vector<4x3xf32>, vector<4x2xf32> -> vector<4x5xf32>
    %100 = tpu.concatenate %90, %98 in 1 : vector<4x3xf32>, vector<4x2xf32> -> vector<4x5xf32>
    %c0_42 = arith.constant 0 : index
    %c0_43 = arith.constant 0 : index
    %101 = vector.load %arg1[%c0_42, %c0_43] : memref<4x5xf32, #tpu.memory_space<vmem>>, vector<4x5xf32>
    %102 = tpu.concatenate %100, %101 in 1 : vector<4x5xf32>, vector<4x5xf32> -> vector<4x10xf32>
    %c0_44 = arith.constant 0 : index
    %c0_45 = arith.constant 0 : index
    %103 = vector.load %arg12[%c0_44, %c0_45] : memref<10x128xf32, #tpu.memory_space<vmem>>, vector<10x128xf32>
    %c0_46 = arith.constant 0 : index
    %c0_47 = arith.constant 0 : index
    %104 = vector.load %arg13[%c0_46, %c0_47] : memref<1x128xf32, #tpu.memory_space<vmem>>, vector<1x128xf32>
    %c0_48 = arith.constant 0 : index
    %c0_49 = arith.constant 0 : index
    %105 = vector.load %arg14[%c0_48, %c0_49] : memref<1x128xf32, #tpu.memory_space<vmem>>, vector<1x128xf32>
    %c0_50 = arith.constant 0 : index
    %c0_51 = arith.constant 0 : index
    %106 = vector.load %arg15[%c0_50, %c0_51] : memref<1x128xf32, #tpu.memory_space<vmem>>, vector<1x128xf32>
    %cst_52 = arith.constant dense<0.000000e+00> : vector<4x128xf32>
    %107 = tpu.matmul %102, %103, %cst_52 {dimension_numbers = #tpu.dot_dimension_numbers<[1], [0], [0], [1], [0, 0, 1, 1], [], []>} : vector<4x10xf32>, vector<10x128xf32>, vector<4x128xf32> -> vector<4x128xf32>
    %108 = vector.broadcast %104 : vector<1x128xf32> to vector<4x128xf32>
    %109 = arith.addf %107, %108 : vector<4x128xf32>
    %cst_53 = arith.constant 0.000000e+00 : f32
    %110 = vector.broadcast %cst_53 : f32 to vector<4x128xf32>
    %111 = arith.maximumf %109, %110 : vector<4x128xf32>
    %cst_54 = arith.constant dense<0.000000e+00> : vector<128xf32>
    %112 = vector.multi_reduction <add>, %111, %cst_54 [0] : vector<4x128xf32> to vector<128xf32>
    %113 = vector.shape_cast %112 : vector<128xf32> to vector<1x128xf32>
    %cst_55 = arith.constant 4.000000e+00 : f32
    %114 = vector.broadcast %cst_55 : f32 to vector<1x128xf32>
    %115 = arith.divf %113, %114 : vector<1x128xf32>
    %116 = vector.broadcast %115 : vector<1x128xf32> to vector<4x128xf32>
    %117 = arith.subf %111, %116 : vector<4x128xf32>
    %118 = arith.mulf %117, %117 : vector<4x128xf32>
    %cst_56 = arith.constant dense<0.000000e+00> : vector<128xf32>
    %119 = vector.multi_reduction <add>, %118, %cst_56 [0] : vector<4x128xf32> to vector<128xf32>
    %120 = vector.shape_cast %119 : vector<128xf32> to vector<1x128xf32>
    %cst_57 = arith.constant 4.000000e+00 : f32
    %121 = vector.broadcast %cst_57 : f32 to vector<1x128xf32>
    %122 = arith.divf %120, %121 : vector<1x128xf32>
    %123 = vector.broadcast %115 : vector<1x128xf32> to vector<4x128xf32>
    %124 = arith.subf %111, %123 : vector<4x128xf32>
    %cst_58 = arith.constant 9.99999974E-6 : f32
    %125 = vector.broadcast %cst_58 : f32 to vector<1x128xf32>
    %126 = arith.addf %122, %125 : vector<1x128xf32>
    %127 = math.rsqrt %126 : vector<1x128xf32>
    %128 = vector.broadcast %127 : vector<1x128xf32> to vector<4x128xf32>
    %129 = arith.mulf %124, %128 : vector<4x128xf32>
    %130 = vector.broadcast %105 : vector<1x128xf32> to vector<4x128xf32>
    %131 = arith.mulf %129, %130 : vector<4x128xf32>
    %132 = vector.broadcast %106 : vector<1x128xf32> to vector<4x128xf32>
    %133 = arith.addf %131, %132 : vector<4x128xf32>
    %c0_59 = arith.constant 0 : index
    %c0_60 = arith.constant 0 : index
    %134 = vector.load %arg16[%c0_59, %c0_60] : memref<128x128xf32, #tpu.memory_space<vmem>>, vector<128x128xf32>
    %c0_61 = arith.constant 0 : index
    %c0_62 = arith.constant 0 : index
    %135 = vector.load %arg17[%c0_61, %c0_62] : memref<1x128xf32, #tpu.memory_space<vmem>>, vector<1x128xf32>
    %c0_63 = arith.constant 0 : index
    %c0_64 = arith.constant 0 : index
    %136 = vector.load %arg18[%c0_63, %c0_64] : memref<1x128xf32, #tpu.memory_space<vmem>>, vector<1x128xf32>
    %c0_65 = arith.constant 0 : index
    %c0_66 = arith.constant 0 : index
    %137 = vector.load %arg19[%c0_65, %c0_66] : memref<1x128xf32, #tpu.memory_space<vmem>>, vector<1x128xf32>
    %cst_67 = arith.constant dense<0.000000e+00> : vector<4x128xf32>
    %138 = tpu.matmul %133, %134, %cst_67 {dimension_numbers = #tpu.dot_dimension_numbers<[1], [0], [0], [1], [0, 0, 1, 1], [], []>} : vector<4x128xf32>, vector<128x128xf32>, vector<4x128xf32> -> vector<4x128xf32>
    %139 = vector.broadcast %135 : vector<1x128xf32> to vector<4x128xf32>
    %140 = arith.addf %138, %139 : vector<4x128xf32>
    %cst_68 = arith.constant 0.000000e+00 : f32
    %141 = vector.broadcast %cst_68 : f32 to vector<4x128xf32>
    %142 = arith.maximumf %140, %141 : vector<4x128xf32>
    %cst_69 = arith.constant dense<0.000000e+00> : vector<128xf32>
    %143 = vector.multi_reduction <add>, %142, %cst_69 [0] : vector<4x128xf32> to vector<128xf32>
    %144 = vector.shape_cast %143 : vector<128xf32> to vector<1x128xf32>
    %cst_70 = arith.constant 4.000000e+00 : f32
    %145 = vector.broadcast %cst_70 : f32 to vector<1x128xf32>
    %146 = arith.divf %144, %145 : vector<1x128xf32>
    %147 = vector.broadcast %146 : vector<1x128xf32> to vector<4x128xf32>
    %148 = arith.subf %142, %147 : vector<4x128xf32>
    %149 = arith.mulf %148, %148 : vector<4x128xf32>
    %cst_71 = arith.constant dense<0.000000e+00> : vector<128xf32>
    %150 = vector.multi_reduction <add>, %149, %cst_71 [0] : vector<4x128xf32> to vector<128xf32>
    %151 = vector.shape_cast %150 : vector<128xf32> to vector<1x128xf32>
    %cst_72 = arith.constant 4.000000e+00 : f32
    %152 = vector.broadcast %cst_72 : f32 to vector<1x128xf32>
    %153 = arith.divf %151, %152 : vector<1x128xf32>
    %154 = vector.broadcast %146 : vector<1x128xf32> to vector<4x128xf32>
    %155 = arith.subf %142, %154 : vector<4x128xf32>
    %cst_73 = arith.constant 9.99999974E-6 : f32
    %156 = vector.broadcast %cst_73 : f32 to vector<1x128xf32>
    %157 = arith.addf %153, %156 : vector<1x128xf32>
    %158 = math.rsqrt %157 : vector<1x128xf32>
    %159 = vector.broadcast %158 : vector<1x128xf32> to vector<4x128xf32>
    %160 = arith.mulf %155, %159 : vector<4x128xf32>
    %161 = vector.broadcast %136 : vector<1x128xf32> to vector<4x128xf32>
    %162 = arith.mulf %160, %161 : vector<4x128xf32>
    %163 = vector.broadcast %137 : vector<1x128xf32> to vector<4x128xf32>
    %164 = arith.addf %162, %163 : vector<4x128xf32>
    %c0_74 = arith.constant 0 : index
    %c0_75 = arith.constant 0 : index
    %165 = vector.load %arg20[%c0_74, %c0_75] : memref<128x2xf32, #tpu.memory_space<vmem>>, vector<128x2xf32>
    %c0_76 = arith.constant 0 : index
    %c0_77 = arith.constant 0 : index
    %166 = vector.load %arg21[%c0_76, %c0_77] : memref<1x2xf32, #tpu.memory_space<vmem>>, vector<1x2xf32>
    %cst_78 = arith.constant dense<0.000000e+00> : vector<4x2xf32>
    %167 = tpu.matmul %164, %165, %cst_78 {dimension_numbers = #tpu.dot_dimension_numbers<[1], [0], [0], [1], [0, 0, 1, 1], [], []>} : vector<4x128xf32>, vector<128x2xf32>, vector<4x2xf32> -> vector<4x2xf32>
    %168 = vector.broadcast %166 : vector<1x2xf32> to vector<4x2xf32>
    %169 = arith.addf %167, %168 : vector<4x2xf32>
    %cst_79 = arith.constant 5.000000e-01 : f32
    %170 = vector.broadcast %cst_79 : f32 to vector<4x2xf32>
    %171 = arith.mulf %170, %169 : vector<4x2xf32>
    %172 = math.tanh %171 : vector<4x2xf32>
    %cst_80 = arith.constant 1.000000e+00 : f32
    %173 = vector.broadcast %cst_80 : f32 to vector<4x2xf32>
    %174 = arith.addf %172, %173 : vector<4x2xf32>
    %cst_81 = arith.constant 5.000000e-01 : f32
    %175 = vector.broadcast %cst_81 : f32 to vector<4x2xf32>
    %176 = arith.mulf %175, %174 : vector<4x2xf32>
    %177 = tpu.concatenate %99, %176 in 1 : vector<4x5xf32>, vector<4x2xf32> -> vector<4x7xf32>
    %178 = tpu.concatenate %100, %176 in 1 : vector<4x5xf32>, vector<4x2xf32> -> vector<4x7xf32>
    %cst_82 = arith.constant 0.000000e+00 : f32
    %179 = vector.broadcast %cst_82 : f32 to vector<4x121xf32>
    %180 = tpu.concatenate %177, %179 in 1 : vector<4x7xf32>, vector<4x121xf32> -> vector<4x128xf32>
    %181 = tpu.concatenate %178, %179 in 1 : vector<4x7xf32>, vector<4x121xf32> -> vector<4x128xf32>
    %c0_83 = arith.constant 0 : index
    %c0_84 = arith.constant 0 : index
    %182 = vector.load %arg22[%c0_83, %c0_84] : memref<4x128xf32, #tpu.memory_space<vmem>>, vector<4x128xf32>
    tpu.vector_store %arg22[%c0_83, %c0_84], %180 {strides = array<i32>} : memref<4x128xf32, #tpu.memory_space<vmem>>, vector<4x128xf32>,
    %c0_85 = arith.constant 0 : index
    %c0_86 = arith.constant 0 : index
    %183 = vector.load %arg23[%c0_85, %c0_86] : memref<4x128xf32, #tpu.memory_space<vmem>>, vector<4x128xf32>
    tpu.vector_store %arg23[%c0_85, %c0_86], %181 {strides = array<i32>} : memref<4x128xf32, #tpu.memory_space<vmem>>, vector<4x128xf32>,
    return
  }
}

</mosaic_0001>

<bundles_post_ra>
// kernel: tpu_custom_call.1
= control target key start
LH: loop header
LB: loop body
LE: loop exit
PB: predicated region body
PF: predicated region fallthrough
CT: control target
= control target key end

     0   :  { %s1476_s0 = inlined_call_operand.hbm [shape: f32[4,5], index: 0, kind: input, shape index: {}]   ;;  %s1477_s1 = inlined_call_operand.hbm [shape: f32[4,5], index: 1, kind: input, shape index: {}]   ;;  %s1478_s2 = inlined_call_operand.vmem [shape: f32[5,128], index: 2, kind: input, shape index: {}]   ;;  %s1479_s3 = inlined_call_operand.vmem [shape: f32[1,128], index: 3, kind: input, shape index: {}]   ;;  %s1480_s4 = inlined_call_operand.hbm [shape: f32[1,128], index: 4, kind: input, shape index: {}]   ;;  %s1481_s5 = inlined_call_operand.hbm [shape: f32[1,128], index: 5, kind: input, shape index: {}]   ;;  %s1482_s6 = inlined_call_operand.vmem [shape: f32[128,128], index: 6, kind: input, shape index: {}]   ;;  %s1483_s7 = inlined_call_operand.hbm [shape: f32[1,128], index: 7, kind: input, shape index: {}]   ;;  %s1484_s8 = inlined_call_operand.hbm [shape: f32[1,128], index: 8, kind: input, shape index: {}]   ;;  %s1485_s9 = inlined_call_operand.hbm [shape: f32[1,128], index: 9, kind: input, shape index: {}]   ;;  %s1486_s10 = inlined_call_operand.vmem [shape: f32[128,5], index: 10, kind: input, shape index: {}]   ;;  %s1487_s11 = inlined_call_operand.hbm [shape: f32[1,5], index: 11, kind: input, shape index: {}]   ;;  %s1488_s12 = inlined_call_operand.hbm [shape: f32[10,128], index: 12, kind: input, shape index: {}]   ;;  %s1489_s13 = inlined_call_operand.vmem [shape: f32[1,128], index: 13, kind: input, shape index: {}]   ;;  %s1490_s14 = inlined_call_operand.vmem [shape: f32[1,128], index: 14, kind: input, shape index: {}]   ;;  %s1491_s15 = inlined_call_operand.vmem [shape: f32[1,128], index: 15, kind: input, shape index: {}]   ;;  %s1492_s16 = inlined_call_operand.vmem [shape: f32[128,128], index: 16, kind: input, shape index: {}]   ;;  %s1493_s17 = inlined_call_operand.vmem [shape: f32[1,128], index: 17, kind: input, shape index: {}]   ;;  %s1494_s18 = inlined_call_operand.vmem [shape: f32[1,128], index: 18, kind: input, shape index: {}]   ;;  %s1495_s19 = inlined_call_operand.vmem [shape: f32[1,128], index: 19, kind: input, shape index: {}]   ;;  %s1496_s20 = inlined_call_operand.vmem [shape: f32[128,2], index: 20, kind: input, shape index: {}]   ;;  %s1497_s21 = inlined_call_operand.vmem [shape: f32[1,2], index: 21, kind: input, shape index: {}]   ;;  %s1498_s22 = inlined_call_operand.hbm [shape: f32[4,128], index: 22, kind: output, shape index: {0}]   ;;  %s1499_s23 = inlined_call_operand.hbm [shape: f32[4,128], index: 23, kind: output, shape index: {1}]  }
   0x1   :  { %1501 = sst [smem:[#allocation27_spill]] %s1476_s0 }
   0x2   :  { %1502 = sst [smem:[#allocation28_spill]] %s1477_s1 }
   0x3   :  { %1503 = sst [smem:[#allocation29_spill]] %s1478_s2 }
   0x4   :  { %1504 = sst [smem:[#allocation30_spill]] %s1479_s3 }
   0x5   :  { %1505 = sst [smem:[#allocation31_spill]] %s1480_s4 }
   0x6   :  { %1506 = sst [smem:[#allocation32_spill]] %s1481_s5 }
   0x7   :  { %1507 = sst [smem:[#allocation33_spill]] %s1482_s6 }
   0x8   :  { %1508 = sst [smem:[#allocation34_spill]] %s1483_s7 }
   0x9   :  { %1509 = sst [smem:[#allocation35_spill]] %s1499_s23 }
   0xa   :  { %29 = vsyncpa [#allocation3], 0 }
   0xb   :  { %30 = vsyncpa [#allocation6], 0 }
   0xc   :  { %31 = vsyncpa [#allocation9], 0 }
   0xd   :  { %32 = vsyncpa [#allocation12], 0 }
   0xe   :  { %33 = vsyncpa [#allocation15], 0 }
   0xf   :  { %34 = vsyncpa [#allocation4], 0  ;;  %s1510_s24 = sld [smem:[#allocation28_spill]] }
  0x15   :  { %s52_s25 = sshll.u32 %s1510_s24, 4  ;;  %s53_s25 = int_to_ptr.hbm [resolvable:$true] %s52_s25 }
  0x16   :  { %35 = vsyncpa [#allocation19], 0  ;;  %s1045_s5 = smov [#allocation5]   ;;  %s1511_s6 = sld [smem:[#allocation32_spill]] }
  0x17   :  { %s54_s1 = sshll.u32 %s1045_s5, 4  ;;  %s1046_s7 = smov [#allocation8]   ;;  %s55_s1 = int_to_ptr.vmem [resolvable:$true] %s54_s1 }
  0x18   :  { %57 = dma.hbm_to_vmem [thread:$0]  %s53_s25, 64, %s55_s1, [#allocation6]  }
  0x19   :  { %s80_s28 = sshll.u32 %s1046_s7, 4  ;;  %s102_s0 = sshll.u32 %s1484_s8, 4  ;;  %s81_s28 = int_to_ptr.vmem [resolvable:$true] %s80_s28  ;;  %s103_s0 = int_to_ptr.hbm [resolvable:$true] %s102_s0 }
  0x1a   :  { %s126_s24 = sshll.u32 %s1487_s11, 4  ;;  %s1047_s5 = smov [#allocation11]   ;;  %s127_s24 = int_to_ptr.hbm [resolvable:$true] %s126_s24 }
  0x1b   :  { %s104_s23 = sshll.u32 %s1047_s5, 4  ;;  %s1048_s25 = smov [#allocation14]   ;;  %s105_s23 = int_to_ptr.vmem [resolvable:$true] %s104_s23 }
  0x1c   :  { %s78_s27 = sshll.u32 %s1511_s6, 4  ;;  %s128_s1 = sshll.u32 %s1048_s25, 4  ;;  %s79_s27 = int_to_ptr.hbm [resolvable:$true] %s78_s27  ;;  %s129_s1 = int_to_ptr.vmem [resolvable:$true] %s128_s1 }
  0x1d   :  { %83 = dma.hbm_to_vmem [thread:$0]  %s79_s27, 16, %s81_s28, [#allocation9]  }
  0x1e   :  { %107 = dma.hbm_to_vmem [thread:$0]  %s103_s0, 16, %s105_s23, [#allocation12]  }
  0x1f   :  { %s1512_s6 = sld [smem:[#allocation27_spill]]  ;;  %s1049_s3 = smov [#allocation2]  }
  0x20   :  { %131 = dma.hbm_to_vmem [thread:$0]  %s127_s24, 16, %s129_s1, [#allocation15]  }
  0x21   :  { %s1513_s28 = sld [smem:[#allocation31_spill]]  ;;  %s43_s11 = sshll.u32 %s1049_s3, 4  ;;  %s44_s11 = int_to_ptr.vmem [resolvable:$true] %s43_s11 }
  0x22   :  { %s1050_s4 = smov [#allocation7]   ;;  %s1514_s5 = sld [smem:[#allocation34_spill]] }
  0x23   :  { %s69_s23 = sshll.u32 %s1050_s4, 4  ;;  %s113_s1 = sshll.u32 %s1485_s9, 4  ;;  %s70_s23 = int_to_ptr.vmem [resolvable:$true] %s69_s23  ;;  %s114_s1 = int_to_ptr.hbm [resolvable:$true] %s113_s1 }
  0x24   :  { %s1051_s2 = smov [#allocation10]   ;;  %s1052_s8 = smov [#allocation13]  }
  0x25   :  { %s41_s7 = sshll.u32 %s1512_s6, 4  ;;  %s93_s6 = sshll.u32 %s1051_s2, 4  ;;  %s42_s7 = int_to_ptr.hbm [resolvable:$true] %s41_s7  ;;  %s94_s6 = int_to_ptr.vmem [resolvable:$true] %s93_s6 }
  0x26   :  { %46 = dma.hbm_to_vmem [thread:$0]  %s42_s7, 64, %s44_s11, [#allocation3]  }
  0x27   :  { %s67_s29 = sshll.u32 %s1513_s28, 4  ;;  %s115_s7 = sshll.u32 %s1052_s8, 4  ;;  %s68_s29 = int_to_ptr.hbm [resolvable:$true] %s67_s29  ;;  %s116_s7 = int_to_ptr.vmem [resolvable:$true] %s115_s7 }
  0x28   :  { %s91_s25 = sshll.u32 %s1514_s5, 4  ;;  %s136_s3 = sshll.u32 %s1488_s12, 4  ;;  %s92_s25 = int_to_ptr.hbm [resolvable:$true] %s91_s25  ;;  %s137_s3 = int_to_ptr.hbm [resolvable:$true] %s136_s3 }
  0x29   :  { %72 = dma.hbm_to_vmem [thread:$0]  %s68_s29, 16, %s70_s23, [#allocation6]  }
  0x2a   :  { %96 = dma.hbm_to_vmem [thread:$0]  %s92_s25, 16, %s94_s6, [#allocation9]  }
  0x2b   :  { %118 = dma.hbm_to_vmem [thread:$0]  %s114_s1, 16, %s116_s7, [#allocation12]  }
  0x2c   :  { %s1053_s11 = smov [#allocation16]   ;;  %s1054_s4 = smov 128  }
  0x2d   :  { %s138_s29 = sshll.u32 %s1053_s11, 4  ;;  %s1055_s23 = smov 8   ;;  %s139_s29 = int_to_ptr.vmem [resolvable:$true] %s138_s29 }
  0x2e   :  { %144 = dma.hbm_to_vmem [thread:$0]  %s137_s3, 256, %s139_s29, [#allocation15], %s1054_s4, %s1054_s4, %s1055_s23  }
  0x2f   :  { %1031 = dma.done.wait [#allocation3], 64  }
  0x30   :  { %1032 = vsyncadd [#allocation3], 4294967232 }
  0x31   :  { %1033 = dma.done.wait [#allocation6], 80  }
  0x32   :  { %1034 = vsyncadd [#allocation6], 4294967216 }
  0x33   :  { %1035 = dma.done.wait [#allocation9], 32  }
  0x34   :  { %1036 = vsyncadd [#allocation9], 4294967264 }
  0x35   :  { %1037 = dma.done.wait [#allocation12], 32  }
  0x36   :  { %1038 = vsyncadd [#allocation12], 4294967264 }
  0x37   :  { %1039 = dma.done.wait [#allocation15], 272  }
  0x38   :  { %1040 = vsyncadd [#allocation15], 4294967024  ;;  %vm211_vm0 = vcmask 1044480   ;;  %vm207_vm1 = vcmask 39936   ;;  %s1515_s0 = sld [smem:[#allocation29_spill]]  ;;  %v1056_v2 = vmov 4.0  }
  0x39   :  { %v199_v1 = vld [vmem:[#allocation2] sm:$0xf]  ;;  %749 = vrcp.f32 %v1056_v2  ;;  %s1516_s25 = sld [smem:[#allocation30_spill]]  ;;  %vm236_vm2 = vcmask 1043456   ;;  %v736_v54 = vld [vmem:[#allocation7] ss:$0 sm:$0xff] }
  0x3a   :  { %s1517_s1 = sld [smem:[#allocation33_spill]]  ;;  %v737_v57 = vld [vmem:[#allocation8] ss:$0 sm:$0xff]  ;;  %v738_v60 = vld [vmem:[#allocation10] ss:$0 sm:$0xff]  ;;  %v378_v63 = vld [vmem:[%s1486_s10 + $0x78] sm:$0xff] }
  0x3b   :  { %383 = vmatpush.msra.mxu2 %v378_v63  ;;  %vm403_vm10 = vcmask 19456  }
  0x3e   :  { %v200_v0 = vld [vmem:[%s1515_s0] sm:$0x1f]  ;;  %s1518_s0 = sld [smem:[#allocation35_spill]] }
  0x3f   :  { %714 = vmatpush.msk.msra.mxu0 %vm211_vm0, %v200_v0  ;;  %v750_v3 = vpop.eup %749  ;;  %v735_v4 = vld [vmem:[%s1516_s25] ss:$0 sm:$0xff] }
  0x40   :  { %715 = vmatmul.msk.f32.vlgmr.msra.gmra.mxu0 %vm207_vm1, %v199_v1  ;;  %v245_v5 = vmul.f32 4.0, %v750_v3  ;;  %v297_v8 = vld [vmem:[%s1517_s1 + $0x78] sm:$0xff]  ;;  %v296_v11 = vld [vmem:[%s1517_s1 + $0x70] sm:$0xff]  ;;  %v295_v13 = vld [vmem:[%s1517_s1 + $0x68] sm:$0xff]  ;;  %vm249_vm3 = vweird.f32 %v750_v3 }
  0x41   :  { %304 = vmatpush.msra.mxu1 %v297_v8  ;;  %v294_v16 = vld [vmem:[%s1517_s1 + $0x60] sm:$0xff]  ;;  %v293_v18 = vld [vmem:[%s1517_s1 + $0x58] sm:$0xff]  ;;  %v292_v21 = vld [vmem:[%s1517_s1 + $0x50] sm:$0xff] }
  0x42   :  { %v246_v10 = vsub.f32 1.0, %v245_v5  ;;  %v291_v23 = vld [vmem:[%s1517_s1 + $0x48] sm:$0xff]  ;;  %v290_v26 = vld [vmem:[%s1517_s1 + $0x40] sm:$0xff]  ;;  %v289_v28 = vld [vmem:[%s1517_s1 + $0x38] sm:$0xff] }
  0x43   :  { %305 = vmatpush.msra.mxu1 %v296_v11  ;;  %v288_v30 = vld [vmem:[%s1517_s1 + $0x30] sm:$0xff]  ;;  %v287_v32 = vld [vmem:[%s1517_s1 + $0x28] sm:$0xff]  ;;  %v286_v34 = vld [vmem:[%s1517_s1 + $0x20] sm:$0xff] }
  0x44   :  { %v247_v15 = vmul.f32 %v750_v3, %v246_v10  ;;  %v285_v37 = vld [vmem:[%s1517_s1 + $0x18] sm:$0xff]  ;;  %v284_v39 = vld [vmem:[%s1517_s1 + $0x10] sm:$0xff]  ;;  %v283_v40 = vld [vmem:[%s1517_s1 + $0x8] sm:$0xff]  ;;  %s695_s30 = sshll.u32 %s1518_s0, 4  ;;  %s696_s30 = int_to_ptr.hbm [resolvable:$true] %s695_s30 }
  0x45   :  { %306 = vmatpush.msra.mxu1 %v295_v13  ;;  %v282_v42 = vld [vmem:[%s1517_s1] sm:$0xff]  ;;  %v377_v1 = vld [vmem:[%s1486_s10 + $0x70] sm:$0xff]  ;;  %v372_v11 = vld [vmem:[%s1486_s10 + $0x48] sm:$0xff]  ;;  %s1060_s1 = smov [#allocation18]  }
  0x46   :  { %v248_v20 = vadd.f32 %v750_v3, %v247_v15  ;;  %384 = vmatpush.msra.mxu2 %v377_v1  ;;  %v375_v5 = vld [vmem:[%s1486_s10 + $0x60] sm:$0xff]  ;;  %v370_v15 = vld [vmem:[%s1486_s10 + $0x38] sm:$0xff]  ;;  %s693_s9 = sshll.u32 %s1060_s1, 4  ;;  %s694_s9 = int_to_ptr.vmem [resolvable:$true] %s693_s9 }
  0x47   :  { %307 = vmatpush.msra.mxu1 %v294_v16  ;;  %v371_v13 = vld [vmem:[%s1486_s10 + $0x40] sm:$0xff] }
  0x48   :  { %v1237_v25 = vsel %vm249_vm3, %v750_v3, %v248_v20  ;;  %v376_v3 = vld [vmem:[%s1486_s10 + $0x68] sm:$0xff]  ;;  %vm478_vm3 = vcmask 1041408  }
  0x49   :  { %308 = vmatpush.msra.mxu1 %v293_v18  ;;  %385 = vmatpush.msra.mxu2 %v376_v3 }
  0x4b   :  { %309 = vmatpush.msra.mxu1 %v292_v21  ;;  %386 = vmatpush.msra.mxu2 %v375_v5  ;;  %v367_v21 = vld [vmem:[%s1486_s10 + $0x20] sm:$0xff] }
  0x4d   :  { %310 = vmatpush.msra.mxu1 %v291_v23 }
  0x4f   :  { %311 = vmatpush.msra.mxu1 %v290_v26 }
  0x51   :  { %312 = vmatpush.msra.mxu1 %v289_v28  ;;  %v364_v28 = vld [vmem:[%s1486_s10 + $0x8] sm:$0xff] }
  0x53   :  { %313 = vmatpush.msra.mxu1 %v288_v30  ;;  %v363_v30 = vld [vmem:[%s1486_s10] sm:$0xff] }
  0x55   :  { %314 = vmatpush.msra.mxu1 %v287_v32 }
  0x57   :  { %315 = vmatpush.msra.mxu1 %v286_v34 }
  0x59   :  { %316 = vmatpush.msra.mxu1 %v285_v37 }
  0x5b   :  { %317 = vmatpush.msra.mxu1 %v284_v39 }
  0x5d   :  { %318 = vmatpush.msra.mxu1 %v283_v40 }
  0x5f   :  { %319 = vmatpush.msra.mxu1 %v282_v42  ;;  %v739_v42 = vld [vmem:[#allocation11] ss:$0 sm:$0xff] }
  0xbd   :  { %v232_v6 = vpop.f32.mrf.mxu0 }
  0xbe   :  { %v233_v7 = vadd.f32 %v735_v4, %v232_v6 }
  0xc0   :  { %v235_v9 = vmax.f32 %v233_v7, 0.0  ;;  %v374_v7 = vld [vmem:[%s1486_s10 + $0x58] sm:$0xff] }
  0xc1   :  { %387 = vmatpush.msra.mxu2 %v374_v7 }
  0xc2   :  { %v237_v12 = vsel %vm236_vm2, %v235_v9, 0.0 }
  0xc3   :  { %v238_v14 = vrot.slane %v237_v12, 4 }
  0xc5   :  { %v239_v17 = vadd.f32 %v238_v14, %v237_v12 }
  0xc7   :  { %v240_v19 = vrot.slane %v239_v17, 2 }
  0xc9   :  { %v241_v22 = vadd.f32 %v240_v19, %v239_v17  ;;  %v369_v17 = vld [vmem:[%s1486_s10 + $0x30] sm:$0xff]  ;;  %v368_v19 = vld [vmem:[%s1486_s10 + $0x28] sm:$0xff] }
  0xcb   :  { %v242_v24 = vrot.slane %v241_v22, 1 }
  0xcd   :  { %v243_v27 = vadd.f32 %v242_v24, %v241_v22  ;;  %v366_v24 = vld [vmem:[%s1486_s10 + $0x18] sm:$0xff] }
  0xcf   :  { %v251_v29 = vmul.f32 %v1237_v25, %v243_v27  ;;  %v365_v27 = vld [vmem:[%s1486_s10 + $0x10] sm:$0xff] }
  0xd1   :  { %v252_v31 = vsub.f32 %v235_v9, %v251_v29  ;;  %v373_v9 = vld [vmem:[%s1486_s10 + $0x50] sm:$0xff]  ;;  %s1057_s10 = smov 5  }
  0xd2   :  { %388 = vmatpush.msra.mxu2 %v373_v9 }
  0xd3   :  { %v253_v33 = vmul.f32 %v252_v31, %v252_v31 }
  0xd4   :  { %389 = vmatpush.msra.mxu2 %v372_v11 }
  0xd5   :  { %v254_v35 = vsel %vm236_vm2, %v253_v33, 0.0 }
  0xd6   :  { %v255_v36 = vrot.slane %v254_v35, 4  ;;  %390 = vmatpush.msra.mxu2 %v371_v13 }
  0xd8   :  { %v256_v38 = vadd.f32 %v255_v36, %v254_v35  ;;  %391 = vmatpush.msra.mxu2 %v370_v15 }
  0xda   :  { %v257_v41 = vrot.slane %v256_v38, 2  ;;  %392 = vmatpush.msra.mxu2 %v369_v17  ;;  %v460_v17 = vld [vmem:[#allocation5] sm:$0xf] }
  0xdc   :  { %v258_v43 = vadd.f32 %v257_v41, %v256_v38  ;;  %393 = vmatpush.msra.mxu2 %v368_v19  ;;  %v466_v19 = vld [vmem:[#allocation16] sm:$0xff] }
  0xde   :  { %v259_v44 = vrot.slane %v258_v43, 1  ;;  %394 = vmatpush.msra.mxu2 %v367_v21 }
  0xe0   :  { %v260_v45 = vadd.f32 %v259_v44, %v258_v43  ;;  %395 = vmatpush.msra.mxu2 %v366_v24 }
  0xe2   :  { %v261_v46 = vmul.f32 %v260_v45, %v1237_v25  ;;  %396 = vmatpush.msra.mxu2 %v365_v27  ;;  %v740_v45 = vld [vmem:[#allocation13] ss:$0 sm:$0xff] }
  0xe4   :  { %v262_v47 = vadd.f32 1e-05, %v261_v46  ;;  %397 = vmatpush.msra.mxu2 %v364_v28 }
  0xe6   :  { %751 = vrsqrt.f32 %v262_v47  ;;  %vm269_vm5 = vweird.f32 %v262_v47  ;;  %398 = vmatpush.msra.mxu2 %v363_v30  ;;  %v1058_v30 = vmov 0.0  }
  0xec   :  { %v752_v48 = vpop.eup %751 }
  0xed   :  { %v264_v49 = vmul.f32 %v752_v48, %v262_v47  ;;  %vm270_vm4 = vweird.f32 %v752_v48 }
  0xee   :  { %vm271_vm6 = vmor %vm269_vm5, %vm270_vm4  ;;  %vm457_vm5 = vcmask 23552  }
  0xef   :  { %v265_v50 = vmul.f32 %v752_v48, %v264_v49 }
  0xf1   :  { %v266_v51 = vmul.f32 0.5, %v265_v50 }
  0xf3   :  { %v267_v52 = vsub.f32 1.5, %v266_v51 }
  0xf5   :  { %v268_v53 = vmul.f32 %v752_v48, %v267_v52 }
  0xf7   :  { %v272_v55 = vsel %vm271_vm6, %v752_v48, %v268_v53  ;;  %v741_v48 = vld [vmem:[#allocation14] ss:$0 sm:$0xff]  ;;  %vm474_vm6 = vcmask 80896  }
  0xf8   :  { %v273_v56 = vmul.f32 %v272_v55, %v252_v31 }
  0xfa   :  { %v277_v58 = vmul.f32 %v736_v54, %v273_v56 }
  0xfc   :  { %v281_v59 = vadd.f32 %v737_v57, %v277_v58 }
  0xfe   :  { %320 = vmatmul.f32.vlgmr.msra.gmra.mxu1 %v281_v59 }
 0x17b   :  { %v321_v61 = vpop.f32.mrf.mxu1 }
 0x17c   :  { %v322_v62 = vadd.f32 %v738_v60, %v321_v61 }
 0x17e   :  { %v324_v0 = vmax.f32 %v322_v62, 0.0 }
 0x180   :  { %v325_v2 = vsel %vm236_vm2, %v324_v0, 0.0 }
 0x181   :  { %v326_v4 = vrot.slane %v325_v2, 4 }
 0x183   :  { %v327_v6 = vadd.f32 %v326_v4, %v325_v2 }
 0x185   :  { %v328_v8 = vrot.slane %v327_v6, 2 }
 0x187   :  { %v329_v10 = vadd.f32 %v328_v8, %v327_v6  ;;  %v428_v6 = vlaneseq }
 0x189   :  { %v330_v12 = vrot.slane %v329_v10, 1  ;;  %v429_v7 = vand.u32 127, %v428_v6 }
 0x18b   :  { %v331_v14 = vadd.f32 %v330_v12, %v329_v10 }
 0x18d   :  { %v332_v16 = vmul.f32 %v331_v14, %v1237_v25 }
 0x18f   :  { %v333_v18 = vsub.f32 %v324_v0, %v332_v16 }
 0x191   :  { %v334_v20 = vmul.f32 %v333_v18, %v333_v18 }
 0x193   :  { %v335_v22 = vsel %vm236_vm2, %v334_v20, 0.0 }
 0x194   :  { %v336_v23 = vrot.slane %v335_v22, 4 }
 0x196   :  { %v337_v26 = vadd.f32 %v336_v23, %v335_v22 }
 0x198   :  { %v338_v29 = vrot.slane %v337_v26, 2 }
 0x19a   :  { %v339_v31 = vadd.f32 %v338_v29, %v337_v26 }
 0x19c   :  { %v340_v32 = vrot.slane %v339_v31, 1 }
 0x19e   :  { %v341_v33 = vadd.f32 %v340_v32, %v339_v31 }
 0x1a0   :  { %v342_v34 = vmul.f32 %v341_v33, %v1237_v25 }
 0x1a2   :  { %v343_v35 = vadd.f32 1e-05, %v342_v34 }
 0x1a4   :  { %753 = vrsqrt.f32 %v343_v35  ;;  %vm350_vm8 = vweird.f32 %v343_v35 }
 0x1aa   :  { %v754_v36 = vpop.eup %753 }
 0x1ab   :  { %v345_v37 = vmul.f32 %v754_v36, %v343_v35  ;;  %vm351_vm7 = vweird.f32 %v754_v36  ;;  %v742_v35 = vld [vmem:[%s1489_s13] ss:$0 sm:$0xff]  ;;  %s684_s13 = sshll.u32 %s1498_s22, 4  ;;  %s685_s13 = int_to_ptr.hbm [resolvable:$true] %s684_s13 }
 0x1ac   :  { %vm352_vm9 = vmor %vm350_vm8, %vm351_vm7 }
 0x1ad   :  { %v346_v38 = vmul.f32 %v754_v36, %v345_v37 }
 0x1af   :  { %v347_v39 = vmul.f32 0.5, %v346_v38  ;;  %v556_v38 = vld [vmem:[%s1492_s16 + $0x78] sm:$0xff] }
 0x1b0   :  { %563 = vmatpush.msrb.mxu0 %v556_v38 }
 0x1b1   :  { %v348_v40 = vsub.f32 1.5, %v347_v39 }
 0x1b3   :  { %v349_v41 = vmul.f32 %v754_v36, %v348_v40  ;;  %v555_v40 = vld [vmem:[%s1492_s16 + $0x70] sm:$0xff] }
 0x1b4   :  { %564 = vmatpush.msrb.mxu0 %v555_v40 }
 0x1b5   :  { %v353_v43 = vsel %vm352_vm9, %v754_v36, %v349_v41 }
 0x1b6   :  { %v354_v44 = vmul.f32 %v353_v43, %v333_v18  ;;  %v467_v18 = vld [vmem:[#allocation16 + $0x8] sm:$0x3] }
 0x1b7   :  { %717 = vmatpush.msk.msra.mxu3 %vm478_vm3, %v467_v18 }
 0x1b8   :  { %v358_v46 = vmul.f32 %v739_v42, %v354_v44  ;;  %v554_v42 = vld [vmem:[%s1492_s16 + $0x68] sm:$0xff]  ;;  %v553_v44 = vld [vmem:[%s1492_s16 + $0x60] sm:$0xff] }
 0x1b9   :  { %497 = vmatpush.msra.mxu3 %v466_v19  ;;  %565 = vmatpush.msrb.mxu0 %v554_v42 }
 0x1ba   :  { %v362_v47 = vadd.f32 %v740_v45, %v358_v46  ;;  %v552_v46 = vld [vmem:[%s1492_s16 + $0x58] sm:$0xff] }
 0x1bb   :  { %566 = vmatpush.msrb.mxu0 %v553_v44 }
 0x1bc   :  { %399 = vmatmul.f32.vlgmr.msra.gmra.mxu2 %v362_v47 }
 0x1bd   :  { %567 = vmatpush.msrb.mxu0 %v552_v46 }
 0x23f   :  { %v400_v49 = vpop.f32.mrf.mxu2 }
 0x240   :  { %v401_v50 = vadd.f32 %v741_v48, %v400_v49  ;;  %v551_v48 = vld [vmem:[%s1492_s16 + $0x50] sm:$0xff] }
 0x241   :  { %568 = vmatpush.msrb.mxu0 %v551_v48 }
 0x242   :  { %v404_v51 = vsel %vm403_vm10, %v401_v50, -inf  ;;  %v453_v20 = vmul.f32 0.5, %v401_v50 }
 0x243   :  { %405 = vmax.xlane.f32.xlu0 %v404_v51 }
 0x2b6   :  { %v406_v52 = vpop.xlane.xlu0 %405 }
 0x2b7   :  { %v407_v53 = vsub.f32 %v401_v50, %v406_v52  ;;  %v550_v50 = vld [vmem:[%s1492_s16 + $0x48] sm:$0xff]  ;;  %v549_v52 = vld [vmem:[%s1492_s16 + $0x40] sm:$0xff] }
 0x2b8   :  { %569 = vmatpush.msrb.mxu0 %v550_v50 }
 0x2b9   :  { %v408_v54 = vmul.f32 1.442695, %v407_v53 }
 0x2ba   :  { %570 = vmatpush.msrb.mxu0 %v549_v52 }
 0x2bb   :  { %755 = vpow2.f32 %v408_v54  ;;  %v548_v54 = vld [vmem:[%s1492_s16 + $0x38] sm:$0xff] }
 0x2bc   :  { %571 = vmatpush.msrb.mxu0 %v548_v54  ;;  %v625_v54 = vld [vmem:[%s1496_s20 + $0x18] sm:$0xff] }
 0x2c1   :  { %v756_v55 = vpop.eup %755 }
 0x2c2   :  { %v410_v56 = vsel %vm403_vm10, %v756_v55, 0.0 }
 0x2c3   :  { %411 = vadd.xlane.f32.xlu0 %v410_v56  ;;  %v547_v56 = vld [vmem:[%s1492_s16 + $0x30] sm:$0xff] }
 0x2c4   :  { %572 = vmatpush.msrb.mxu0 %v547_v56  ;;  %v624_v56 = vld [vmem:[%s1496_s20 + $0x10] sm:$0xff] }
 0x336   :  { %v412_v57 = vpop.xlane.xlu0 %411 }
 0x337   :  { %757 = vrcp.f32 %v412_v57  ;;  %v424_v61 = vand.u32 2147483648, %v412_v57  ;;  %v422_v63 = vand.u32 2147483647, %v412_v57  ;;  %vm418_vm12 = vweird.f32 %v412_v57 }
 0x338   :  { %759 = vtanh.f32 %v453_v20  ;;  %v744_v20 = vld [vmem:[%s1491_s15] ss:$0 sm:$0xff] }
 0x339   :  { %v425_v1 = vor.u32 1.1754944e-38, %v424_v61  ;;  %vm423_vm14 = vcmp.eq.f32.partialorder %v422_v63, 8.507059e+37  ;;  %v544_v63 = vld [vmem:[%s1492_s16 + $0x18] sm:$0xff] }
 0x33d   :  { %v758_v58 = vpop.eup %757 }
 0x33e   :  { %v414_v59 = vmul.f32 %v758_v58, %v412_v57  ;;  %vm419_vm11 = vweird.f32 %v758_v58  ;;  %v760_v22 = vpop.eup %759 }
 0x33f   :  { %vm420_vm13 = vmor %vm418_vm12, %vm419_vm11  ;;  %v455_v24 = vadd.f32 1.0, %v760_v22  ;;  %vm672_vm12 = vcmask 56320  }
 0x340   :  { %v415_v60 = vsub.f32 1.0, %v414_v59 }
 0x341   :  { %v1330_v29 = vmul.f32 0.5, %v455_v24 }
 0x342   :  { %v416_v62 = vmul.f32 %v758_v58, %v415_v60  ;;  %v545_v60 = vld [vmem:[%s1492_s16 + $0x20] sm:$0xff] }
 0x344   :  { %v417_v0 = vadd.f32 %v758_v58, %v416_v62 }
 0x346   :  { %v421_v2 = vsel %vm420_vm13, %v758_v58, %v417_v0  ;;  %v546_v58 = vld [vmem:[%s1492_s16 + $0x28] sm:$0xff] }
 0x347   :  { %v426_v3 = vsel %vm423_vm14, %v425_v1, %v421_v2  ;;  %573 = vmatpush.msrb.mxu0 %v546_v58  ;;  %v543_v1 = vld [vmem:[%s1492_s16 + $0x10] sm:$0xff]  ;;  %v542_v2 = vld [vmem:[%s1492_s16 + $0x8] sm:$0xff] }
 0x348   :  { %v1323_v4 = vmul.f32 %v756_v55, %v426_v3 }
 0x349   :  { %574 = vmatpush.msrb.mxu0 %v545_v60 }
 0x34a   :  { %v430_v5 = vsel %vm403_vm10, %v1323_v4, -inf }
 0x34b   :  { %431 = vmax.xlane.f32.xlu1 %v430_v5  ;;  %575 = vmatpush.msrb.mxu0 %v544_v63  ;;  %v541_v5 = vld [vmem:[%s1492_s16] sm:$0xff] }
 0x34d   :  { %576 = vmatpush.msrb.mxu0 %v543_v1 }
 0x34f   :  { %577 = vmatpush.msrb.mxu0 %v542_v2 }
 0x351   :  { %578 = vmatpush.msrb.mxu0 %v541_v5 }
 0x3be   :  { %v432_v8 = vpop.xlane.xlu1 %431 }
 0x3bf   :  { %vm433_vm15 = vcmp.eq.f32.partialorder %v1323_v4, %v432_v8 }
 0x3c0   :  { %v434_v9 = vsel %vm433_vm15, %v429_v7, 3 }
 0x3c1   :  { %v435_v10 = vsel %vm403_vm10, %v434_v9, 2147483647 }
 0x3c2   :  { %v437_v11 = vshra.s32 %v435_v10, 16  ;;  %v436_v13 = vand.u32 65535, %v435_v10 }
 0x3c4   :  { %v439_v12 = vcvt.s32.f32 %v437_v11  ;;  %v438_v15 = vcvt.s32.f32 %v436_v13 }
 0x3c6   :  { %440 = vmin.xlane.f32.xlu1 %v439_v12 }
 0x439   :  { %v441_v14 = vpop.xlane.xlu1 %440 }
 0x43a   :  { %vm442_vm0 = vcmp.eq.f32.partialorder %v439_v12, %v441_v14  ;;  %v447_v21 = vcvt.f32.s32 %v441_v14 }
 0x43b   :  { %v443_v16 = vsel %vm442_vm0, %v438_v15, inf }
 0x43c   :  { %444 = vmin.xlane.f32.xlu2 %v443_v16  ;;  %v448_v26 = vshll.u32 %v447_v21, 16 }
 0x454   :  { %462 = vrot.lane.b32.xlu2 %v460_v17, %s1057_s10  ;;  %v743_v17 = vld [vmem:[%s1490_s14] ss:$0 sm:$0xff] }
 0x4af   :  { %v445_v23 = vpop.xlane.xlu2 %444 }
 0x4b0   :  { %v446_v27 = vcvt.f32.s32 %v445_v23  ;;  %v745_v23 = vld [vmem:[%s1493_s17] ss:$0 sm:$0xff] }
 0x4b2   :  { %v449_v28 = vadd.s32 %v448_v26, %v446_v27  ;;  %v637_v27 = vld [vmem:[%s1496_s20 + $0x78] sm:$0xff] }
 0x4b3   :  { %642 = vmatpush.msrb.mxu3 %v637_v27 }
 0x4b4   :  { %vm450_vm4 = vcmp.eq.s32.totalorder %v429_v7, %v449_v28 }
 0x4b5   :  { %v716_v31 = vsel %vm450_vm4, 1.0, %v1058_v30  ;;  %v636_v30 = vld [vmem:[%s1496_s20 + $0x70] sm:$0xff] }
 0x4b6   :  { %v1334_v32 = vsel %vm457_vm5, %v716_v31, %v1330_v29  ;;  %643 = vmatpush.msrb.mxu3 %v636_v30 }
 0x4b7   :  { %v463_v33 = vpop.permute.xlu2 %462 }
 0x4b8   :  { %v465_v34 = vsel %vm207_vm1, %v1334_v32, %v463_v33  ;;  %v635_v33 = vld [vmem:[%s1496_s20 + $0x68] sm:$0xff] }
 0x4b9   :  { %718 = vmatmul.msk.f32.vlgmr.msra.gmra.mxu3 %vm474_vm6, %v465_v34 }
 0x4ba   :  { %644 = vmatpush.msrb.mxu3 %v635_v33 }
 0x53c   :  { %v499_v36 = vpop.f32.mrf.mxu3 }
 0x53d   :  { %v500_v37 = vadd.f32 %v742_v35, %v499_v36  ;;  %v634_v35 = vld [vmem:[%s1496_s20 + $0x60] sm:$0xff] }
 0x53e   :  { %645 = vmatpush.msrb.mxu3 %v634_v35 }
 0x53f   :  { %v502_v39 = vmax.f32 %v500_v37, 0.0  ;;  %v633_v37 = vld [vmem:[%s1496_s20 + $0x58] sm:$0xff] }
 0x540   :  { %646 = vmatpush.msrb.mxu3 %v633_v37 }
 0x541   :  { %v503_v41 = vsel %vm236_vm2, %v502_v39, 0.0 }
 0x542   :  { %v504_v43 = vrot.slane %v503_v41, 4 }
 0x544   :  { %v505_v45 = vadd.f32 %v504_v43, %v503_v41  ;;  %v631_v41 = vld [vmem:[%s1496_s20 + $0x48] sm:$0xff]  ;;  %v630_v43 = vld [vmem:[%s1496_s20 + $0x40] sm:$0xff] }
 0x546   :  { %v506_v47 = vrot.slane %v505_v45, 2 }
 0x548   :  { %v507_v49 = vadd.f32 %v506_v47, %v505_v45  ;;  %v629_v45 = vld [vmem:[%s1496_s20 + $0x38] sm:$0xff]  ;;  %v628_v47 = vld [vmem:[%s1496_s20 + $0x30] sm:$0xff] }
 0x54a   :  { %v508_v51 = vrot.slane %v507_v49, 1 }
 0x54c   :  { %v509_v53 = vadd.f32 %v508_v51, %v507_v49  ;;  %v627_v49 = vld [vmem:[%s1496_s20 + $0x28] sm:$0xff]  ;;  %v626_v51 = vld [vmem:[%s1496_s20 + $0x20] sm:$0xff] }
 0x54e   :  { %v510_v55 = vmul.f32 %v509_v53, %v1237_v25 }
 0x550   :  { %v511_v57 = vsub.f32 %v502_v39, %v510_v55  ;;  %v632_v39 = vld [vmem:[%s1496_s20 + $0x50] sm:$0xff] }
 0x551   :  { %647 = vmatpush.msrb.mxu3 %v632_v39 }
 0x552   :  { %v512_v59 = vmul.f32 %v511_v57, %v511_v57 }
 0x553   :  { %648 = vmatpush.msrb.mxu3 %v631_v41 }
 0x554   :  { %v513_v61 = vsel %vm236_vm2, %v512_v59, 0.0  ;;  %v622_v59 = vld [vmem:[%s1496_s20] sm:$0xff] }
 0x555   :  { %v514_v62 = vrot.slane %v513_v61, 4  ;;  %649 = vmatpush.msrb.mxu3 %v630_v43 }
 0x557   :  { %v515_v0 = vadd.f32 %v514_v62, %v513_v61  ;;  %650 = vmatpush.msrb.mxu3 %v629_v45 }
 0x559   :  { %v516_v3 = vrot.slane %v515_v0, 2  ;;  %651 = vmatpush.msrb.mxu3 %v628_v47 }
 0x55b   :  { %v517_v6 = vadd.f32 %v516_v3, %v515_v0  ;;  %652 = vmatpush.msrb.mxu3 %v627_v49 }
 0x55d   :  { %v518_v7 = vrot.slane %v517_v6, 1  ;;  %653 = vmatpush.msrb.mxu3 %v626_v51 }
 0x55f   :  { %v519_v8 = vadd.f32 %v518_v7, %v517_v6  ;;  %654 = vmatpush.msrb.mxu3 %v625_v54 }
 0x561   :  { %v520_v9 = vmul.f32 %v519_v8, %v1237_v25  ;;  %655 = vmatpush.msrb.mxu3 %v624_v56  ;;  %v746_v8 = vld [vmem:[%s1494_s18] ss:$0 sm:$0xff]  ;;  %s1059_s18 = smov [#allocation17]  }
 0x562   :  { %s682_s4 = sshll.u32 %s1059_s18, 4  ;;  %s683_s4 = int_to_ptr.vmem [resolvable:$true] %s682_s4 }
 0x563   :  { %v521_v10 = vadd.f32 1e-05, %v520_v9 }
 0x565   :  { %761 = vrsqrt.f32 %v521_v10  ;;  %vm528_vm8 = vweird.f32 %v521_v10 }
 0x56b   :  { %v762_v11 = vpop.eup %761 }
 0x56c   :  { %v523_v12 = vmul.f32 %v762_v11, %v521_v10  ;;  %vm529_vm7 = vweird.f32 %v762_v11 }
 0x56d   :  { %vm530_vm9 = vmor %vm528_vm8, %vm529_vm7 }
 0x56e   :  { %v524_v13 = vmul.f32 %v762_v11, %v523_v12 }
 0x570   :  { %v525_v14 = vmul.f32 0.5, %v524_v13  ;;  %v748_v13 = vld [vmem:[%s1497_s21] ss:$0 sm:$0xff] }
 0x572   :  { %v526_v15 = vsub.f32 1.5, %v525_v14 }
 0x574   :  { %v527_v16 = vmul.f32 %v762_v11, %v526_v15 }
 0x576   :  { %v531_v18 = vsel %vm530_vm9, %v762_v11, %v527_v16 }
 0x577   :  { %v532_v19 = vmul.f32 %v531_v18, %v511_v57  ;;  %v623_v57 = vld [vmem:[%s1496_s20 + $0x8] sm:$0xff] }
 0x578   :  { %656 = vmatpush.msrb.mxu3 %v623_v57 }
 0x579   :  { %v536_v21 = vmul.f32 %v743_v17, %v532_v19 }
 0x57a   :  { %657 = vmatpush.msrb.mxu3 %v622_v59 }
 0x57b   :  { %v540_v22 = vadd.f32 %v744_v20, %v536_v21  ;;  %v458_v20 = vsel %vm457_vm5, %v1323_v4, %v1330_v29 }
 0x57d   :  { %579 = vmatmul.f32.vlgmr.msrb.gmra.mxu0 %v540_v22 }
 0x5fa   :  { %v580_v24 = vpop.f32.mrf.mxu0 }
 0x5fb   :  { %v581_v26 = vadd.f32 %v745_v23, %v580_v24 }
 0x5fd   :  { %v583_v28 = vmax.f32 %v581_v26, 0.0 }
 0x5ff   :  { %v584_v31 = vsel %vm236_vm2, %v583_v28, 0.0 }
 0x600   :  { %v585_v34 = vrot.slane %v584_v31, 4 }
 0x602   :  { %v586_v36 = vadd.f32 %v585_v34, %v584_v31 }
 0x604   :  { %v587_v38 = vrot.slane %v586_v36, 2 }
 0x606   :  { %v588_v40 = vadd.f32 %v587_v38, %v586_v36 }
 0x608   :  { %v589_v42 = vrot.slane %v588_v40, 1 }
 0x60a   :  { %v590_v44 = vadd.f32 %v589_v42, %v588_v40 }
 0x60c   :  { %v591_v46 = vmul.f32 %v590_v44, %v1237_v25 }
 0x60e   :  { %v592_v48 = vsub.f32 %v583_v28, %v591_v46 }
 0x610   :  { %v593_v50 = vmul.f32 %v592_v48, %v592_v48 }
 0x612   :  { %v594_v52 = vsel %vm236_vm2, %v593_v50, 0.0 }
 0x613   :  { %v595_v53 = vrot.slane %v594_v52, 4 }
 0x615   :  { %v596_v55 = vadd.f32 %v595_v53, %v594_v52 }
 0x617   :  { %v597_v58 = vrot.slane %v596_v55, 2 }
 0x619   :  { %v598_v60 = vadd.f32 %v597_v58, %v596_v55 }
 0x61b   :  { %v599_v61 = vrot.slane %v598_v60, 1 }
 0x61d   :  { %v600_v62 = vadd.f32 %v599_v61, %v598_v60 }
 0x61f   :  { %v601_v63 = vmul.f32 %v600_v62, %v1237_v25  ;;  %v747_v25 = vld [vmem:[%s1495_s19] ss:$0 sm:$0xff] }
 0x621   :  { %v602_v0 = vadd.f32 1e-05, %v601_v63 }
 0x623   :  { %763 = vrsqrt.f32 %v602_v0  ;;  %vm609_vm10 = vweird.f32 %v602_v0 }
 0x629   :  { %v764_v1 = vpop.eup %763 }
 0x62a   :  { %v604_v2 = vmul.f32 %v764_v1, %v602_v0  ;;  %vm610_vm2 = vweird.f32 %v764_v1 }
 0x62b   :  { %vm611_vm11 = vmor %vm609_vm10, %vm610_vm2 }
 0x62c   :  { %v605_v3 = vmul.f32 %v764_v1, %v604_v2 }
 0x62e   :  { %v606_v5 = vmul.f32 0.5, %v605_v3 }
 0x630   :  { %v607_v6 = vsub.f32 1.5, %v606_v5 }
 0x632   :  { %v608_v7 = vmul.f32 %v764_v1, %v607_v6 }
 0x634   :  { %v612_v9 = vsel %vm611_vm11, %v764_v1, %v608_v7 }
 0x635   :  { %v613_v10 = vmul.f32 %v612_v9, %v592_v48 }
 0x637   :  { %v617_v11 = vmul.f32 %v746_v8, %v613_v10 }
 0x639   :  { %v621_v12 = vadd.f32 %v747_v25, %v617_v11 }
 0x63b   :  { %658 = vmatmul.f32.vlgmr.msrb.gmra.mxu3 %v621_v12 }
 0x6be   :  { %v659_v14 = vpop.f32.mrf.mxu3 }
 0x6bf   :  { %v660_v15 = vadd.f32 %v748_v13, %v659_v14 }
 0x6c1   :  { %v662_v16 = vmul.f32 0.5, %v660_v15 }
 0x6c3   :  { %765 = vtanh.f32 %v662_v16 }
 0x6c9   :  { %v766_v17 = vpop.eup %765 }
 0x6ca   :  { %v664_v18 = vadd.f32 1.0, %v766_v17 }
 0x6cc   :  { %v665_v19 = vmul.f32 0.5, %v664_v18 }
 0x6ce   :  { %667 = vrot.lane.b32.xlu0 %v665_v19, %s1057_s10 }
 0x740   :  { %v668_v21 = vpop.permute.xlu0 %667 }
 0x741   :  { %v670_v22 = vsel %vm207_vm1, %v458_v20, %v668_v21  ;;  %v671_v23 = vsel %vm207_vm1, %v1334_v32, %v668_v21 }
 0x742   :  { %v673_v24 = vsel %vm672_vm12, %v670_v22, 0.0  ;;  %v674_v26 = vsel %vm672_vm12, %v671_v23, 0.0 }
 0x743   :  { %675 = vst [vmem:[#allocation17] sm:$0xf] %v673_v24 }
 0x744   :  { %676 = vst [vmem:[#allocation18] sm:$0xf] %v674_v26  ;;  %687 = dma.vmem_to_hbm [thread:$0]  %s683_s4, 64, %s685_s13, [#allocation4]  }
 0x745   :  { %698 = dma.vmem_to_hbm [thread:$0]  %s694_s9, 64, %s696_s30, [#allocation19]  }
 0x746   :  { %1041 = dma.done.wait [#allocation4], 64  }
 0x747   :  { %1042 = vsyncadd [#allocation4], 4294967232 }
 0x748   :  { %1043 = dma.done.wait [#allocation19], 64  }
 0x749   :  { %1044 = vsyncadd [#allocation19], 4294967232 }
 0x74a   :  { %707 = vsyncpa [#allocation3], 1 }
 0x74b   :  { %708 = vsyncpa [#allocation6], 1 }
 0x74c   :  { %709 = vsyncpa [#allocation9], 1 }
 0x74d   :  { %710 = vsyncpa [#allocation12], 1 }
 0x74e   :  { %711 = vsyncpa [#allocation15], 1 }
 0x74f   :  { %712 = vsyncpa [#allocation4], 1 }
 0x750   :  { %713 = vsyncpa [#allocation19], 1 }

</bundles_post_ra>
